<compile_context>
chip_gen: v7x
topology: tpu7x:2x2x1
jax: 0.10.0
libtpu: 0.0.40
codegen_flags: <defaults>
</compile_context>

<pallas_src>
import numpy as np

import jax
import jax.numpy as jnp
from jax.experimental import pallas as pl
from jax.experimental.pallas import tpu as pltpu

D_MODEL = 512
VOCAB = 1000


def generator_kernel(x_ref, w_ref, b_ref, o_ref):
    # logits = x @ W + b  (bf16 x bf16 -> f32 accumulation on the MXU)
    logits = jnp.dot(x_ref[...], w_ref[...], preferred_element_type=jnp.float32)
    logits = logits + b_ref[...]                       # (tm, V) + (1, V) broadcast
    # log_softmax over the vocab (lane) dim, all in f32.
    m = jnp.max(logits, axis=-1, keepdims=True)
    shifted = logits - m
    lse = jnp.log(jnp.sum(jnp.exp(shifted), axis=-1, keepdims=True))
    o_ref[...] = (shifted - lse).astype(o_ref.dtype)


def prepare_generator_params(weight, bias):
    """One-time parameter prep (do NOT call per forward pass).

    weight: (vocab, d_model) in PyTorch nn.Linear layout; bias: (vocab,).
    Returns ((d_model, vocab) bf16 weight, (1, vocab) f32 bias) ready for the kernel.
    """
    w_t = jnp.asarray(weight).T.astype(jnp.bfloat16)           # (d_model, vocab)
    b2d = jnp.asarray(bias).astype(jnp.float32).reshape(1, -1)  # (1, vocab)
    return w_t, b2d


def generator_forward(x, w_t, b2d, *, tm_max=512, out_dtype=jnp.float32):
    """x: (B, S, d_model); w_t: (d_model, vocab) bf16; b2d: (1, vocab) f32."""
    B, S, D = x.shape
    V = w_t.shape[1]
    M = B * S

    # Activations go to the MXU in bf16; accumulation stays f32 inside the kernel.
    x2d = x.reshape(M, D).astype(jnp.bfloat16)

    # Row tile: as large as possible up to tm_max; pad the tail if M isn't divisible.
    tm = min(tm_max, M)
    m_pad = pl.cdiv(M, tm) * tm
    if m_pad != M:
        x2d = jnp.pad(x2d, ((0, m_pad - M), (0, 0)))

    cost = pl.CostEstimate(
        flops=2 * m_pad * D * V,
        transcendentals=m_pad * V,
        bytes_accessed=(m_pad * D * 2            # x (bf16)
                        + D * V * 2              # weight (bf16)
                        + V * 4                  # bias (f32)
                        + m_pad * V * int(np.dtype(out_dtype).itemsize)),
    )

    out = pl.pallas_call(
        generator_kernel,
        out_shape=jax.ShapeDtypeStruct((m_pad, V), out_dtype),
        grid_spec=pltpu.PrefetchScalarGridSpec(
            num_scalar_prefetch=0,
            grid=(m_pad // tm,),
            in_specs=[
                pl.BlockSpec((tm, D), lambda i: (i, 0)),   # x row tile
                pl.BlockSpec((D, V), lambda i: (0, 0)),    # weight, resident (const index)
                pl.BlockSpec((1, V), lambda i: (0, 0)),    # bias row, resident
            ],
            out_specs=pl.BlockSpec((tm, V), lambda i: (i, 0)),
        ),
        compiler_params=pltpu.CompilerParams(
            dimension_semantics=("parallel",),
        ),
        cost_estimate=cost,
    )(x2d, w_t, b2d)

    if m_pad != M:
        out = out[:M]
    return out.reshape(B, S, V)


if __name__ == "__main__":
    key = jax.random.PRNGKey(0)
    k_x, k_w, k_b, k_x2 = jax.random.split(key, 4)

    B, S = 2, 8  # small batch/seq; d_model=512, vocab=1000 per the module __init__
    x = jax.random.normal(k_x, (B, S, D_MODEL), dtype=jnp.float32)

    # Deterministic nn.Linear-style init (uniform in [-1/sqrt(d_model), 1/sqrt(d_model)])
    bound = 1.0 / (D_MODEL ** 0.5)
    weight = jax.random.uniform(k_w, (VOCAB, D_MODEL), minval=-bound, maxval=bound,
                                dtype=jnp.float32)
    bias = jax.random.uniform(k_b, (VOCAB,), minval=-bound, maxval=bound,
                              dtype=jnp.float32)

    # One-time parameter prep (transpose + bf16 cast), outside the forward path.
    w_t, b2d = prepare_generator_params(weight, bias)

    out = generator_forward(x, w_t, b2d)
    out = jax.block_until_ready(out)
    assert out.shape == (B, S, VOCAB)

    # (a) Reference using the same bf16-rounded inputs but exact f32 math: tight tolerance
    #     on the kernel's fused matmul + log_softmax itself.
    xb = x.astype(jnp.bfloat16).astype(jnp.float32)
    wb = w_t.astype(jnp.float32)                       # (D, V)
    ref_bf16_in = jax.nn.log_softmax(xb @ wb + bias, axis=-1)
    assert jnp.max(jnp.abs(out - ref_bf16_in)) < 2e-3

    # (b) Full-f32 reference of F.log_softmax(self.proj(x), dim=-1): looser tolerance that
    #     accounts for the bf16 input rounding.
    ref_f32 = jax.nn.log_softmax(x @ weight.T + bias, axis=-1)
    assert jnp.max(jnp.abs(out - ref_f32)) < 5e-2

    # (c) Exercise the non-divisible-M (padded tail) path with a deliberately small tile.
    B2, S2 = 1, 21
    x2 = jax.random.normal(k_x2, (B2, S2, D_MODEL), dtype=jnp.float32)
    out2 = jax.block_until_ready(generator_forward(x2, w_t, b2d, tm_max=8))
    ref2 = jax.nn.log_softmax(x2.astype(jnp.bfloat16).astype(jnp.float32) @ wb + bias,
                              axis=-1)
    assert out2.shape == (B2, S2, VOCAB)
    assert jnp.max(jnp.abs(out2 - ref2)) < 2e-3

    print("KERNEL_OK")
</pallas_src>

<mosaic_0001>
module attributes {stable_mosaic.version = 11 : i64} {
  func.func @generator_kernel(%arg0: i32, %arg1: memref<16x512xbf16, #tpu.memory_space<vmem>>, %arg2: memref<512x1000xbf16, #tpu.memory_space<vmem>>, %arg3: memref<1x1000xf32, #tpu.memory_space<vmem>>, %arg4: memref<16x1000xf32, #tpu.memory_space<vmem>>) attributes {dimension_semantics = [#tpu.dimension_semantics<parallel>], iteration_bounds = array<i64: 1>, scalar_prefetch = 0 : i64, scratch_operands = 0 : i64, tpu.core_type = #tpu.core_type<tc>, window_params = [{transform_indices = @transform_0, window_bounds = array<i64: 16, 512>}, {pipeline_mode = #tpu.pipeline_mode<synchronous>, transform_indices = @transform_1, window_bounds = array<i64: 512, 1000>}, {pipeline_mode = #tpu.pipeline_mode<synchronous>, transform_indices = @transform_2, window_bounds = array<i64: 1, 1000>}, {transform_indices = @transform_3, window_bounds = array<i64: 16, 1000>}]} {
    %c0 = arith.constant 0 : index
    %c0_0 = arith.constant 0 : index
    %0 = vector.load %arg1[%c0, %c0_0] : memref<16x512xbf16, #tpu.memory_space<vmem>>, vector<16x512xbf16>
    %c0_1 = arith.constant 0 : index
    %c0_2 = arith.constant 0 : index
    %1 = vector.load %arg2[%c0_1, %c0_2] : memref<512x1000xbf16, #tpu.memory_space<vmem>>, vector<512x1000xbf16>
    %cst = arith.constant dense<0.000000e+00> : vector<16x1000xf32>
    %2 = tpu.matmul %0, %1, %cst {dimension_numbers = #tpu.dot_dimension_numbers<[1], [0], [0], [1], [0, 0, 1, 1], [], []>} : vector<16x512xbf16>, vector<512x1000xbf16>, vector<16x1000xf32> -> vector<16x1000xf32>
    %c0_3 = arith.constant 0 : index
    %c0_4 = arith.constant 0 : index
    %3 = vector.load %arg3[%c0_3, %c0_4] : memref<1x1000xf32, #tpu.memory_space<vmem>>, vector<1x1000xf32>
    %4 = vector.broadcast %3 : vector<1x1000xf32> to vector<16x1000xf32>
    %5 = arith.addf %2, %4 : vector<16x1000xf32>
    %cst_5 = arith.constant dense<0xFF800000> : vector<16xf32>
    %6 = vector.multi_reduction <maximumf>, %5, %cst_5 [1] : vector<16x1000xf32> to vector<16xf32>
    %7 = vector.shape_cast %6 : vector<16xf32> to vector<16x1xf32>
    %8 = vector.broadcast %7 : vector<16x1xf32> to vector<16x1000xf32>
    %9 = arith.subf %5, %8 : vector<16x1000xf32>
    %10 = math.exp %9 : vector<16x1000xf32>
    %cst_6 = arith.constant dense<0.000000e+00> : vector<16xf32>
    %11 = vector.multi_reduction <add>, %10, %cst_6 [1] : vector<16x1000xf32> to vector<16xf32>
    %12 = vector.shape_cast %11 : vector<16xf32> to vector<16x1xf32>
    %13 = math.log %12 : vector<16x1xf32>
    %14 = vector.broadcast %13 : vector<16x1xf32> to vector<16x1000xf32>
    %15 = arith.subf %9, %14 : vector<16x1000xf32>
    %c0_7 = arith.constant 0 : index
    %c0_8 = arith.constant 0 : index
    %16 = vector.load %arg4[%c0_7, %c0_8] : memref<16x1000xf32, #tpu.memory_space<vmem>>, vector<16x1000xf32>
    tpu.vector_store %arg4[%c0_7, %c0_8], %15 {strides = array<i32>} : memref<16x1000xf32, #tpu.memory_space<vmem>>, vector<16x1000xf32>,
    return
  }
  func.func @transform_0(%arg0: i32) -> (i32, i32) {
    %c0_i32 = arith.constant 0 : i32
    %c0_i32_0 = arith.constant 0 : i32
    return %arg0, %c0_i32 : i32, i32
  }
  func.func @transform_1(%arg0: i32) -> (i32, i32) {
    %c0_i32 = arith.constant 0 : i32
    %c0_i32_0 = arith.constant 0 : i32
    %c0_i32_1 = arith.constant 0 : i32
    return %c0_i32, %c0_i32_0 : i32, i32
  }
  func.func @transform_2(%arg0: i32) -> (i32, i32) {
    %c0_i32 = arith.constant 0 : i32
    %c0_i32_0 = arith.constant 0 : i32
    %c0_i32_1 = arith.constant 0 : i32
    return %c0_i32, %c0_i32_0 : i32, i32
  }
  func.func @transform_3(%arg0: i32) -> (i32, i32) {
    %c0_i32 = arith.constant 0 : i32
    %c0_i32_0 = arith.constant 0 : i32
    return %arg0, %c0_i32 : i32, i32
  }
}

</mosaic_0001>

<bundles_post_ra>
// kernel: tpu_custom_call.1
= control target key start
LH: loop header
LB: loop body
LE: loop exit
PB: predicated region body
PF: predicated region fallthrough
CT: control target
= control target key end

     0   :  { %s3375_s0 = inlined_call_operand.vmem [shape: bf16[16,512], index: 0, kind: input, shape index: {}]   ;;  %s3376_s1 = inlined_call_operand.vmem [shape: bf16[512,1000], index: 1, kind: input, shape index: {}]   ;;  %s3377_s2 = inlined_call_operand.vmem [shape: f32[1,1000], index: 2, kind: input, shape index: {}]   ;;  %s3378_s3 = inlined_call_operand.hbm [shape: f32[16,1000], index: 3, kind: output, shape index: {}]  }
   0x1   :  { %v19_v0 = vld [vmem:[%s3376_s1] sm:$0xff]  ;;  %v20_v2 = vld [vmem:[%s3376_s1 + $0x8] sm:$0xff] }
   0x2   :  { %v23_v1 = vld [vmem:[%s3376_s1 + $0x20] sm:$0xff]  ;;  %v24_v4 = vld [vmem:[%s3376_s1 + $0x28] sm:$0xff] }
   0x3   :  { %v2107_v3 = vcombine.high %v19_v0, %v23_v1  ;;  %v2106_v5 = vcombine.low %v19_v0, %v23_v1  ;;  %v27_v6 = vld [vmem:[%s3376_s1 + $0x40] sm:$0xff]  ;;  %v2109_v8 = vcombine.high %v20_v2, %v24_v4  ;;  %v2108_v9 = vcombine.low %v20_v2, %v24_v4  ;;  %v28_v11 = vld [vmem:[%s3376_s1 + $0x48] sm:$0xff] }
   0x4   :  { %v31_v7 = vld [vmem:[%s3376_s1 + $0x60] sm:$0xff]  ;;  %v32_v12 = vld [vmem:[%s3376_s1 + $0x68] sm:$0xff] }
   0x5   :  { %v2115_v10 = vcombine.high %v27_v6, %v31_v7  ;;  %v35_v13 = vld [vmem:[%s3376_s1 + $0x80] sm:$0xff]  ;;  %1617 = vmatprep.subr.bf16.mxu0 %v2107_v3  ;;  %v2117_v14 = vcombine.high %v28_v11, %v32_v12  ;;  %v36_v16 = vld [vmem:[%s3376_s1 + $0x88] sm:$0xff]  ;;  %1703 = vmatprep.subr.bf16.mxu1 %v2109_v8  ;;  %v2114_v18 = vcombine.low %v27_v6, %v31_v7 }
   0x6   :  { %v39_v15 = vld [vmem:[%s3376_s1 + $0xa0] sm:$0xff]  ;;  %v40_v17 = vld [vmem:[%s3376_s1 + $0xa8] sm:$0xff]  ;;  %1618 = vmatpush1.bf16.msra.mxu0 %v2106_v5  ;;  %1704 = vmatpush1.bf16.msra.mxu1 %v2108_v9  ;;  %v2116_v19 = vcombine.low %v28_v11, %v32_v12 }
   0x7   :  { %1619 = vmatprep.subr.bf16.mxu0 %v2115_v10  ;;  %v2123_v20 = vcombine.high %v35_v13, %v39_v15  ;;  %1705 = vmatprep.subr.bf16.mxu1 %v2117_v14  ;;  %v2125_v21 = vcombine.high %v36_v16, %v40_v17  ;;  %v43_v22 = vld [vmem:[%s3376_s1 + $0xc0] sm:$0xff]  ;;  %v44_v24 = vld [vmem:[%s3376_s1 + $0xc8] sm:$0xff]  ;;  %v2122_v26 = vcombine.low %v35_v13, %v39_v15 }
   0x8   :  { %v47_v23 = vld [vmem:[%s3376_s1 + $0xe0] sm:$0xff]  ;;  %v48_v25 = vld [vmem:[%s3376_s1 + $0xe8] sm:$0xff]  ;;  %v2124_v27 = vcombine.low %v36_v16, %v40_v17 }
   0x9   :  { %v2131_v28 = vcombine.high %v43_v22, %v47_v23  ;;  %v2133_v29 = vcombine.high %v44_v24, %v48_v25  ;;  %v51_v30 = vld [vmem:[%s3376_s1 + $0x100] sm:$0xff]  ;;  %v52_v32 = vld [vmem:[%s3376_s1 + $0x108] sm:$0xff]  ;;  %v2130_v34 = vcombine.low %v43_v22, %v47_v23  ;;  %v2132_v35 = vcombine.low %v44_v24, %v48_v25 }
   0xa   :  { %1620 = vmatpush1.bf16.msra.mxu0 %v2114_v18  ;;  %1706 = vmatpush1.bf16.msra.mxu1 %v2116_v19  ;;  %v55_v31 = vld [vmem:[%s3376_s1 + $0x120] sm:$0xff]  ;;  %v56_v33 = vld [vmem:[%s3376_s1 + $0x128] sm:$0xff] }
   0xb   :  { %1621 = vmatprep.subr.bf16.mxu0 %v2123_v20  ;;  %1707 = vmatprep.subr.bf16.mxu1 %v2125_v21  ;;  %v2139_v36 = vcombine.high %v51_v30, %v55_v31  ;;  %v2141_v37 = vcombine.high %v52_v32, %v56_v33  ;;  %v59_v38 = vld [vmem:[%s3376_s1 + $0x140] sm:$0xff]  ;;  %v60_v40 = vld [vmem:[%s3376_s1 + $0x148] sm:$0xff]  ;;  %v2138_v42 = vcombine.low %v51_v30, %v55_v31 }
   0xc   :  { %v63_v39 = vld [vmem:[%s3376_s1 + $0x160] sm:$0xff]  ;;  %v64_v41 = vld [vmem:[%s3376_s1 + $0x168] sm:$0xff]  ;;  %v2140_v43 = vcombine.low %v52_v32, %v56_v33 }
   0xd   :  { %v2147_v44 = vcombine.high %v59_v38, %v63_v39  ;;  %v2149_v45 = vcombine.high %v60_v40, %v64_v41  ;;  %v67_v46 = vld [vmem:[%s3376_s1 + $0x180] sm:$0xff]  ;;  %v68_v48 = vld [vmem:[%s3376_s1 + $0x188] sm:$0xff]  ;;  %v2146_v50 = vcombine.low %v59_v38, %v63_v39  ;;  %v2148_v51 = vcombine.low %v60_v40, %v64_v41 }
   0xe   :  { %1622 = vmatpush1.bf16.msra.mxu0 %v2122_v26  ;;  %1708 = vmatpush1.bf16.msra.mxu1 %v2124_v27  ;;  %v71_v47 = vld [vmem:[%s3376_s1 + $0x1a0] sm:$0xff]  ;;  %v72_v49 = vld [vmem:[%s3376_s1 + $0x1a8] sm:$0xff] }
   0xf   :  { %1623 = vmatprep.subr.bf16.mxu0 %v2131_v28  ;;  %1709 = vmatprep.subr.bf16.mxu1 %v2133_v29  ;;  %v2155_v52 = vcombine.high %v67_v46, %v71_v47  ;;  %v2157_v53 = vcombine.high %v68_v48, %v72_v49  ;;  %v75_v54 = vld [vmem:[%s3376_s1 + $0x1c0] sm:$0xff]  ;;  %v76_v57 = vld [vmem:[%s3376_s1 + $0x1c8] sm:$0xff]  ;;  %v2154_v59 = vcombine.low %v67_v46, %v71_v47 }
  0x10   :  { %v79_v55 = vld [vmem:[%s3376_s1 + $0x1e0] sm:$0xff]  ;;  %v80_v58 = vld [vmem:[%s3376_s1 + $0x1e8] sm:$0xff]  ;;  %v2156_v60 = vcombine.low %v68_v48, %v72_v49 }
  0x11   :  { %v2579_v56 = vld [vmem:[%s3375_s0 + $0x4] ss:$16 sps:$4 sm:$0xff]   ;;  %v2163_v61 = vcombine.high %v75_v54, %v79_v55  ;;  %v2165_v62 = vcombine.high %v76_v57, %v80_v58  ;;  %v84_v1 = vld [vmem:[%s3376_s1 + $0x208] sm:$0xff]  ;;  %v2162_v3 = vcombine.low %v75_v54, %v79_v55  ;;  %v2164_v4 = vcombine.low %v76_v57, %v80_v58 }
  0x12   :  { %1624 = vmatpush1.bf16.msra.mxu0 %v2130_v34  ;;  %1710 = vmatpush1.bf16.msra.mxu1 %v2132_v35  ;;  %v83_v63 = vld [vmem:[%s3376_s1 + $0x200] sm:$0xff]  ;;  %v88_v2 = vld [vmem:[%s3376_s1 + $0x228] sm:$0xff] }
  0x13   :  { %1625 = vmatprep.subr.bf16.mxu0 %v2139_v36  ;;  %1711 = vmatprep.subr.bf16.mxu1 %v2141_v37  ;;  %v87_v0 = vld [vmem:[%s3376_s1 + $0x220] sm:$0xff]  ;;  %v2173_v6 = vcombine.high %v84_v1, %v88_v2  ;;  %v92_v9 = vld [vmem:[%s3376_s1 + $0x248] sm:$0xff]  ;;  %v2172_v12 = vcombine.low %v84_v1, %v88_v2 }
  0x14   :  { %1649 = vmatprep.mubr.bf16.mxu0 %v2579_v56  ;;  %1735 = vmatprep.mubr.bf16.mxu1 %v2579_v56  ;;  %v2171_v5 = vcombine.high %v83_v63, %v87_v0  ;;  %v91_v7 = vld [vmem:[%s3376_s1 + $0x240] sm:$0xff]  ;;  %v96_v10 = vld [vmem:[%s3376_s1 + $0x268] sm:$0xff]  ;;  %v2170_v11 = vcombine.low %v83_v63, %v87_v0 }
  0x15   :  { %v95_v8 = vld [vmem:[%s3376_s1 + $0x260] sm:$0xff]  ;;  %v2181_v14 = vcombine.high %v92_v9, %v96_v10  ;;  %v100_v17 = vld [vmem:[%s3376_s1 + $0x288] sm:$0xff]  ;;  %v2180_v20 = vcombine.low %v92_v9, %v96_v10 }
  0x16   :  { %1626 = vmatpush1.bf16.msra.mxu0 %v2138_v42  ;;  %1712 = vmatpush1.bf16.msra.mxu1 %v2140_v43  ;;  %v2179_v13 = vcombine.high %v91_v7, %v95_v8  ;;  %v99_v15 = vld [vmem:[%s3376_s1 + $0x280] sm:$0xff]  ;;  %v104_v18 = vld [vmem:[%s3376_s1 + $0x2a8] sm:$0xff]  ;;  %v2178_v19 = vcombine.low %v91_v7, %v95_v8 }
  0x17   :  { %1627 = vmatprep.subr.bf16.mxu0 %v2147_v44  ;;  %1713 = vmatprep.subr.bf16.mxu1 %v2149_v45  ;;  %v103_v16 = vld [vmem:[%s3376_s1 + $0x2a0] sm:$0xff]  ;;  %v2189_v22 = vcombine.high %v100_v17, %v104_v18  ;;  %v108_v25 = vld [vmem:[%s3376_s1 + $0x2c8] sm:$0xff]  ;;  %v2188_v28 = vcombine.low %v100_v17, %v104_v18 }
  0x18   :  { %v2187_v21 = vcombine.high %v99_v15, %v103_v16  ;;  %v107_v23 = vld [vmem:[%s3376_s1 + $0x2c0] sm:$0xff]  ;;  %v112_v26 = vld [vmem:[%s3376_s1 + $0x2e8] sm:$0xff]  ;;  %v2186_v27 = vcombine.low %v99_v15, %v103_v16 }
  0x19   :  { %v111_v24 = vld [vmem:[%s3376_s1 + $0x2e0] sm:$0xff]  ;;  %v2197_v30 = vcombine.high %v108_v25, %v112_v26  ;;  %v116_v33 = vld [vmem:[%s3376_s1 + $0x308] sm:$0xff]  ;;  %v2196_v36 = vcombine.low %v108_v25, %v112_v26 }
  0x1a   :  { %1628 = vmatpush1.bf16.msra.mxu0 %v2146_v50  ;;  %1714 = vmatpush1.bf16.msra.mxu1 %v2148_v51  ;;  %v2195_v29 = vcombine.high %v107_v23, %v111_v24  ;;  %v115_v31 = vld [vmem:[%s3376_s1 + $0x300] sm:$0xff]  ;;  %v120_v34 = vld [vmem:[%s3376_s1 + $0x328] sm:$0xff]  ;;  %v2194_v35 = vcombine.low %v107_v23, %v111_v24 }
  0x1b   :  { %1629 = vmatprep.subr.bf16.mxu0 %v2155_v52  ;;  %1715 = vmatprep.subr.bf16.mxu1 %v2157_v53  ;;  %v119_v32 = vld [vmem:[%s3376_s1 + $0x320] sm:$0xff]  ;;  %v2205_v38 = vcombine.high %v116_v33, %v120_v34  ;;  %v124_v41 = vld [vmem:[%s3376_s1 + $0x348] sm:$0xff]  ;;  %v2204_v44 = vcombine.low %v116_v33, %v120_v34 }
  0x1c   :  { %v2203_v37 = vcombine.high %v115_v31, %v119_v32  ;;  %v123_v39 = vld [vmem:[%s3376_s1 + $0x340] sm:$0xff]  ;;  %v128_v42 = vld [vmem:[%s3376_s1 + $0x368] sm:$0xff]  ;;  %v2202_v43 = vcombine.low %v115_v31, %v119_v32 }
  0x1d   :  { %v127_v40 = vld [vmem:[%s3376_s1 + $0x360] sm:$0xff]  ;;  %v2213_v46 = vcombine.high %v124_v41, %v128_v42  ;;  %v132_v49 = vld [vmem:[%s3376_s1 + $0x388] sm:$0xff]  ;;  %v2212_v52 = vcombine.low %v124_v41, %v128_v42 }
  0x1e   :  { %1630 = vmatpush1.bf16.msra.mxu0 %v2154_v59  ;;  %1716 = vmatpush1.bf16.msra.mxu1 %v2156_v60  ;;  %v2211_v45 = vcombine.high %v123_v39, %v127_v40  ;;  %v131_v47 = vld [vmem:[%s3376_s1 + $0x380] sm:$0xff]  ;;  %v136_v50 = vld [vmem:[%s3376_s1 + $0x3a8] sm:$0xff]  ;;  %v2210_v51 = vcombine.low %v123_v39, %v127_v40 }
  0x1f   :  { %1631 = vmatprep.subr.bf16.mxu0 %v2163_v61  ;;  %1717 = vmatprep.subr.bf16.mxu1 %v2165_v62  ;;  %v135_v48 = vld [vmem:[%s3376_s1 + $0x3a0] sm:$0xff]  ;;  %v2221_v54 = vcombine.high %v132_v49, %v136_v50  ;;  %v140_v58 = vld [vmem:[%s3376_s1 + $0x3c8] sm:$0xff]  ;;  %v2220_v61 = vcombine.low %v132_v49, %v136_v50 }
  0x20   :  { %v2219_v53 = vcombine.high %v131_v47, %v135_v48  ;;  %v139_v55 = vld [vmem:[%s3376_s1 + $0x3c0] sm:$0xff]  ;;  %v144_v59 = vld [vmem:[%s3376_s1 + $0x3e8] sm:$0xff]  ;;  %v2218_v60 = vcombine.low %v131_v47, %v135_v48 }
  0x21   :  { %v143_v57 = vld [vmem:[%s3376_s1 + $0x3e0] sm:$0xff]  ;;  %v2229_v63 = vcombine.high %v140_v58, %v144_v59  ;;  %v148_v2 = vld [vmem:[%s3376_s1 + $0x408] sm:$0xff] }
  0x22   :  { %1632 = vmatpush1.bf16.msra.mxu0 %v2162_v3  ;;  %1718 = vmatpush1.bf16.msra.mxu1 %v2164_v4  ;;  %v2227_v62 = vcombine.high %v139_v55, %v143_v57  ;;  %v147_v0 = vld [vmem:[%s3376_s1 + $0x400] sm:$0xff]  ;;  %v152_v3 = vld [vmem:[%s3376_s1 + $0x428] sm:$0xff]  ;;  %v2226_v4 = vcombine.low %v139_v55, %v143_v57 }
  0x23   :  { %1633 = vmatprep.subr.bf16.mxu0 %v2171_v5  ;;  %1719 = vmatprep.subr.bf16.mxu1 %v2173_v6  ;;  %v151_v1 = vld [vmem:[%s3376_s1 + $0x420] sm:$0xff]  ;;  %v2228_v5 = vcombine.low %v140_v58, %v144_v59  ;;  %v2237_v7 = vcombine.high %v148_v2, %v152_v3 }
  0x24   :  { %v2235_v6 = vcombine.high %v147_v0, %v151_v1  ;;  %v155_v8 = vld [vmem:[%s3376_s1 + $0x440] sm:$0xff] }
  0x25   :  { %v159_v9 = vld [vmem:[%s3376_s1 + $0x460] sm:$0xff] }
  0x26   :  { %1634 = vmatpush1.bf16.msra.mxu0 %v2170_v11  ;;  %1720 = vmatpush1.bf16.msra.mxu1 %v2172_v12  ;;  %v2706_v10 = vld [vmem:[%s3375_s0] ss:$16 sps:$4 sm:$0xff]   ;;  %v156_v11 = vld [vmem:[%s3376_s1 + $0x448] sm:$0xff]  ;;  %v2243_v15 = vcombine.high %v155_v8, %v159_v9 }
  0x27   :  { %1635 = vmatprep.subr.bf16.mxu0 %v2179_v13  ;;  %1721 = vmatprep.subr.bf16.mxu1 %v2181_v14  ;;  %v160_v12 = vld [vmem:[%s3376_s1 + $0x468] sm:$0xff]  ;;  %v2234_v13 = vcombine.low %v147_v0, %v151_v1  ;;  %v2236_v14 = vcombine.low %v148_v2, %v152_v3  ;;  %v163_v17 = vld [vmem:[%s3376_s1 + $0x480] sm:$0xff] }
  0x28   :  { %v2245_v16 = vcombine.high %v156_v11, %v160_v12  ;;  %v167_v18 = vld [vmem:[%s3376_s1 + $0x4a0] sm:$0xff] }
  0x2a   :  { %1636 = vmatpush1.bf16.msra.mxu0 %v2178_v19  ;;  %1722 = vmatpush1.bf16.msra.mxu1 %v2180_v20  ;;  %v2723_v19 = vld [vmem:[%s3375_s0 + $0xc] ss:$16 sps:$4 sm:$0xff]  }
  0x2b   :  { %1637 = vmatprep.subr.bf16.mxu0 %v2187_v21  ;;  %1723 = vmatprep.subr.bf16.mxu1 %v2189_v22  ;;  %v164_v20 = vld [vmem:[%s3376_s1 + $0x488] sm:$0xff]  ;;  %v2242_v22 = vcombine.low %v155_v8, %v159_v9 }
  0x2c   :  { %v168_v21 = vld [vmem:[%s3376_s1 + $0x4a8] sm:$0xff] }
  0x2e   :  { %1638 = vmatpush1.bf16.msra.mxu0 %v2186_v27  ;;  %1724 = vmatpush1.bf16.msra.mxu1 %v2188_v28 }
  0x2f   :  { %1639 = vmatprep.subr.bf16.mxu0 %v2195_v29  ;;  %1725 = vmatprep.subr.bf16.mxu1 %v2197_v30 }
  0x32   :  { %1640 = vmatpush1.bf16.msra.mxu0 %v2194_v35  ;;  %1726 = vmatpush1.bf16.msra.mxu1 %v2196_v36 }
  0x33   :  { %1641 = vmatprep.subr.bf16.mxu0 %v2203_v37  ;;  %1727 = vmatprep.subr.bf16.mxu1 %v2205_v38 }
  0x36   :  { %1642 = vmatpush1.bf16.msra.mxu0 %v2202_v43  ;;  %1728 = vmatpush1.bf16.msra.mxu1 %v2204_v44 }
  0x37   :  { %1643 = vmatprep.subr.bf16.mxu0 %v2211_v45  ;;  %1729 = vmatprep.subr.bf16.mxu1 %v2213_v46 }
  0x3a   :  { %1644 = vmatpush1.bf16.msra.mxu0 %v2210_v51  ;;  %1730 = vmatpush1.bf16.msra.mxu1 %v2212_v52 }
  0x3b   :  { %1645 = vmatprep.subr.bf16.mxu0 %v2219_v53  ;;  %1731 = vmatprep.subr.bf16.mxu1 %v2221_v54 }
  0x3e   :  { %1646 = vmatpush1.bf16.msra.mxu0 %v2218_v60  ;;  %1732 = vmatpush1.bf16.msra.mxu1 %v2220_v61 }
  0x3f   :  { %1647 = vmatprep.subr.bf16.mxu0 %v2227_v62  ;;  %1733 = vmatprep.subr.bf16.mxu1 %v2229_v63 }
  0x42   :  { %1648 = vmatpush1.bf16.msra.mxu0 %v2226_v4  ;;  %1734 = vmatpush1.bf16.msra.mxu1 %v2228_v5 }
  0x43   :  { %1660 = vmatprep.subr.bf16.mxu0 %v2235_v6  ;;  %1746 = vmatprep.subr.bf16.mxu1 %v2237_v7 }
  0x45   :  { %1650 = vmatmul.mubr.bf16.vlgmr.msra.gmra.mrb[0].mxu0 %v2706_v10  ;;  %1736 = vmatmul.mubr.bf16.vlgmr.msra.gmra.mrb[0].mxu1 %v2706_v10 }
  0x46   :  { %1661 = vmatpush1.bf16.msra.mxu0 %v2234_v13 }
  0x47   :  { %8 = vsyncpa [#allocation3], 0  ;;  %1747 = vmatpush1.bf16.msra.mxu1 %v2236_v14  ;;  %1662 = vmatprep.subr.bf16.mxu0 %v2243_v15  ;;  %v2244_v23 = vcombine.low %v156_v11, %v160_v12  ;;  %v2251_v24 = vcombine.high %v163_v17, %v167_v18  ;;  %v2253_v25 = vcombine.high %v164_v20, %v168_v21  ;;  %v171_v26 = vld [vmem:[%s3376_s1 + $0x4c0] sm:$0xff]  ;;  %v172_v28 = vld [vmem:[%s3376_s1 + $0x4c8] sm:$0xff]  ;;  %vm1966_vm0 = vcmask 850944  }
  0x48   :  { %1748 = vmatprep.subr.bf16.mxu1 %v2245_v16  ;;  %v175_v27 = vld [vmem:[%s3376_s1 + $0x4e0] sm:$0xff]  ;;  %1692 = vmatprep.mubr.bf16.mxu0 %v2723_v19  ;;  %v176_v29 = vld [vmem:[%s3376_s1 + $0x4e8] sm:$0xff]  ;;  %v2250_v30 = vcombine.low %v163_v17, %v167_v18  ;;  %v2252_v31 = vcombine.low %v164_v20, %v168_v21 }
  0x49   :  { %1778 = vmatprep.mubr.bf16.mxu1 %v2723_v19  ;;  %v2259_v32 = vcombine.high %v171_v26, %v175_v27  ;;  %v2261_v33 = vcombine.high %v172_v28, %v176_v29  ;;  %v179_v34 = vld [vmem:[%s3376_s1 + $0x500] sm:$0xff]  ;;  %v180_v36 = vld [vmem:[%s3376_s1 + $0x508] sm:$0xff]  ;;  %v2258_v38 = vcombine.low %v171_v26, %v175_v27  ;;  %v2260_v39 = vcombine.low %v172_v28, %v176_v29 }
  0x4a   :  { %1663 = vmatpush1.bf16.msra.mxu0 %v2242_v22  ;;  %v183_v35 = vld [vmem:[%s3376_s1 + $0x520] sm:$0xff]  ;;  %v184_v37 = vld [vmem:[%s3376_s1 + $0x528] sm:$0xff] }
  0x4b   :  { %1749 = vmatpush1.bf16.msra.mxu1 %v2244_v23  ;;  %1664 = vmatprep.subr.bf16.mxu0 %v2251_v24  ;;  %v2267_v40 = vcombine.high %v179_v34, %v183_v35  ;;  %v2269_v41 = vcombine.high %v180_v36, %v184_v37  ;;  %v187_v42 = vld [vmem:[%s3376_s1 + $0x540] sm:$0xff]  ;;  %v188_v44 = vld [vmem:[%s3376_s1 + $0x548] sm:$0xff]  ;;  %v2266_v46 = vcombine.low %v179_v34, %v183_v35 }
  0x4c   :  { %1750 = vmatprep.subr.bf16.mxu1 %v2253_v25  ;;  %v191_v43 = vld [vmem:[%s3376_s1 + $0x560] sm:$0xff]  ;;  %v192_v45 = vld [vmem:[%s3376_s1 + $0x568] sm:$0xff]  ;;  %v2268_v47 = vcombine.low %v180_v36, %v184_v37 }
  0x4d   :  { %v2275_v48 = vcombine.high %v187_v42, %v191_v43  ;;  %v2277_v49 = vcombine.high %v188_v44, %v192_v45  ;;  %v195_v50 = vld [vmem:[%s3376_s1 + $0x580] sm:$0xff]  ;;  %v196_v52 = vld [vmem:[%s3376_s1 + $0x588] sm:$0xff]  ;;  %v2274_v54 = vcombine.low %v187_v42, %v191_v43  ;;  %v2276_v55 = vcombine.low %v188_v44, %v192_v45 }
  0x4e   :  { %1665 = vmatpush1.bf16.msra.mxu0 %v2250_v30  ;;  %v199_v51 = vld [vmem:[%s3376_s1 + $0x5a0] sm:$0xff]  ;;  %v200_v53 = vld [vmem:[%s3376_s1 + $0x5a8] sm:$0xff] }
  0x4f   :  { %1751 = vmatpush1.bf16.msra.mxu1 %v2252_v31  ;;  %1666 = vmatprep.subr.bf16.mxu0 %v2259_v32  ;;  %v2283_v57 = vcombine.high %v195_v50, %v199_v51  ;;  %v2285_v58 = vcombine.high %v196_v52, %v200_v53  ;;  %v203_v59 = vld [vmem:[%s3376_s1 + $0x5c0] sm:$0xff]  ;;  %v204_v61 = vld [vmem:[%s3376_s1 + $0x5c8] sm:$0xff]  ;;  %v2282_v63 = vcombine.low %v195_v50, %v199_v51 }
  0x50   :  { %1752 = vmatprep.subr.bf16.mxu1 %v2261_v33  ;;  %v207_v60 = vld [vmem:[%s3376_s1 + $0x5e0] sm:$0xff]  ;;  %v208_v62 = vld [vmem:[%s3376_s1 + $0x5e8] sm:$0xff]  ;;  %v2284_v0 = vcombine.low %v196_v52, %v200_v53 }
  0x51   :  { %v2291_v1 = vcombine.high %v203_v59, %v207_v60  ;;  %v2293_v2 = vcombine.high %v204_v61, %v208_v62  ;;  %v211_v3 = vld [vmem:[%s3376_s1 + $0x600] sm:$0xff]  ;;  %v212_v5 = vld [vmem:[%s3376_s1 + $0x608] sm:$0xff]  ;;  %v2290_v7 = vcombine.low %v203_v59, %v207_v60  ;;  %v2292_v8 = vcombine.low %v204_v61, %v208_v62 }
  0x52   :  { %1667 = vmatpush1.bf16.msra.mxu0 %v2258_v38  ;;  %v215_v4 = vld [vmem:[%s3376_s1 + $0x620] sm:$0xff]  ;;  %v216_v6 = vld [vmem:[%s3376_s1 + $0x628] sm:$0xff] }
  0x53   :  { %1753 = vmatpush1.bf16.msra.mxu1 %v2260_v39  ;;  %1668 = vmatprep.subr.bf16.mxu0 %v2267_v40  ;;  %v2299_v9 = vcombine.high %v211_v3, %v215_v4  ;;  %v2301_v11 = vcombine.high %v212_v5, %v216_v6  ;;  %v219_v12 = vld [vmem:[%s3376_s1 + $0x640] sm:$0xff]  ;;  %v220_v14 = vld [vmem:[%s3376_s1 + $0x648] sm:$0xff]  ;;  %v2298_v16 = vcombine.low %v211_v3, %v215_v4 }
  0x54   :  { %1754 = vmatprep.subr.bf16.mxu1 %v2269_v41  ;;  %v223_v13 = vld [vmem:[%s3376_s1 + $0x660] sm:$0xff]  ;;  %v224_v15 = vld [vmem:[%s3376_s1 + $0x668] sm:$0xff]  ;;  %v2300_v17 = vcombine.low %v212_v5, %v216_v6  ;;  %v21_v6 = vld [vmem:[%s3376_s1 + $0x10] sm:$0xff] }
  0x55   :  { %v2307_v18 = vcombine.high %v219_v12, %v223_v13  ;;  %v2309_v20 = vcombine.high %v220_v14, %v224_v15  ;;  %v227_v21 = vld [vmem:[%s3376_s1 + $0x680] sm:$0xff]  ;;  %v228_v23 = vld [vmem:[%s3376_s1 + $0x688] sm:$0xff]  ;;  %v2306_v25 = vcombine.low %v219_v12, %v223_v13  ;;  %v2308_v26 = vcombine.low %v220_v14, %v224_v15  ;;  %v29_v15 = vld [vmem:[%s3376_s1 + $0x50] sm:$0xff] }
  0x56   :  { %1669 = vmatpush1.bf16.msra.mxu0 %v2266_v46  ;;  %v231_v22 = vld [vmem:[%s3376_s1 + $0x6a0] sm:$0xff]  ;;  %v232_v24 = vld [vmem:[%s3376_s1 + $0x6a8] sm:$0xff] }
  0x57   :  { %1755 = vmatpush1.bf16.msra.mxu1 %v2268_v47  ;;  %1670 = vmatprep.subr.bf16.mxu0 %v2275_v48  ;;  %v2315_v27 = vcombine.high %v227_v21, %v231_v22  ;;  %v2317_v28 = vcombine.high %v228_v23, %v232_v24  ;;  %v235_v29 = vld [vmem:[%s3376_s1 + $0x6c0] sm:$0xff]  ;;  %v236_v31 = vld [vmem:[%s3376_s1 + $0x6c8] sm:$0xff]  ;;  %v2314_v33 = vcombine.low %v227_v21, %v231_v22 }
  0x58   :  { %1756 = vmatprep.subr.bf16.mxu1 %v2277_v49  ;;  %v239_v30 = vld [vmem:[%s3376_s1 + $0x6e0] sm:$0xff]  ;;  %v240_v32 = vld [vmem:[%s3376_s1 + $0x6e8] sm:$0xff]  ;;  %v2316_v34 = vcombine.low %v228_v23, %v232_v24 }
  0x59   :  { %v2323_v35 = vcombine.high %v235_v29, %v239_v30  ;;  %v2325_v36 = vcombine.high %v236_v31, %v240_v32  ;;  %v243_v37 = vld [vmem:[%s3376_s1 + $0x700] sm:$0xff]  ;;  %v244_v39 = vld [vmem:[%s3376_s1 + $0x708] sm:$0xff]  ;;  %v2322_v41 = vcombine.low %v235_v29, %v239_v30  ;;  %v2324_v42 = vcombine.low %v236_v31, %v240_v32 }
  0x5a   :  { %1671 = vmatpush1.bf16.msra.mxu0 %v2274_v54  ;;  %v247_v38 = vld [vmem:[%s3376_s1 + $0x720] sm:$0xff]  ;;  %v248_v40 = vld [vmem:[%s3376_s1 + $0x728] sm:$0xff] }
  0x5b   :  { %1757 = vmatpush1.bf16.msra.mxu1 %v2276_v55  ;;  %1672 = vmatprep.subr.bf16.mxu0 %v2283_v57  ;;  %v2331_v43 = vcombine.high %v243_v37, %v247_v38  ;;  %v2333_v44 = vcombine.high %v244_v39, %v248_v40  ;;  %v251_v45 = vld [vmem:[%s3376_s1 + $0x740] sm:$0xff]  ;;  %v252_v47 = vld [vmem:[%s3376_s1 + $0x748] sm:$0xff]  ;;  %v2330_v49 = vcombine.low %v243_v37, %v247_v38 }
  0x5c   :  { %1758 = vmatprep.subr.bf16.mxu1 %v2285_v58  ;;  %v255_v46 = vld [vmem:[%s3376_s1 + $0x760] sm:$0xff]  ;;  %v256_v48 = vld [vmem:[%s3376_s1 + $0x768] sm:$0xff]  ;;  %v2332_v50 = vcombine.low %v244_v39, %v248_v40 }
  0x5d   :  { %v2339_v51 = vcombine.high %v251_v45, %v255_v46  ;;  %v2341_v52 = vcombine.high %v252_v47, %v256_v48  ;;  %v259_v53 = vld [vmem:[%s3376_s1 + $0x780] sm:$0xff]  ;;  %v260_v55 = vld [vmem:[%s3376_s1 + $0x788] sm:$0xff]  ;;  %v2338_v58 = vcombine.low %v251_v45, %v255_v46  ;;  %v2340_v59 = vcombine.low %v252_v47, %v256_v48  ;;  %v61_v48 = vld [vmem:[%s3376_s1 + $0x150] sm:$0xff] }
  0x5e   :  { %1673 = vmatpush1.bf16.msra.mxu0 %v2282_v63  ;;  %v263_v54 = vld [vmem:[%s3376_s1 + $0x7a0] sm:$0xff]  ;;  %v264_v57 = vld [vmem:[%s3376_s1 + $0x7a8] sm:$0xff] }
  0x5f   :  { %1759 = vmatpush1.bf16.msra.mxu1 %v2284_v0  ;;  %1674 = vmatprep.subr.bf16.mxu0 %v2291_v1  ;;  %v2347_v60 = vcombine.high %v259_v53, %v263_v54  ;;  %v2349_v61 = vcombine.high %v260_v55, %v264_v57  ;;  %v267_v62 = vld [vmem:[%s3376_s1 + $0x7c0] sm:$0xff]  ;;  %v268_v0 = vld [vmem:[%s3376_s1 + $0x7c8] sm:$0xff]  ;;  %v2348_v3 = vcombine.low %v260_v55, %v264_v57  ;;  %v69_v57 = vld [vmem:[%s3376_s1 + $0x190] sm:$0xff] }
  0x60   :  { %1760 = vmatprep.subr.bf16.mxu1 %v2293_v2  ;;  %v271_v63 = vld [vmem:[%s3376_s1 + $0x7e0] sm:$0xff]  ;;  %v272_v1 = vld [vmem:[%s3376_s1 + $0x7e8] sm:$0xff]  ;;  %v2346_v2 = vcombine.low %v259_v53, %v263_v54 }
  0x61   :  { %v2355_v4 = vcombine.high %v267_v62, %v271_v63  ;;  %v2357_v5 = vcombine.high %v268_v0, %v272_v1  ;;  %v2356_v12 = vcombine.low %v268_v0, %v272_v1  ;;  %v77_v1 = vld [vmem:[%s3376_s1 + $0x1d0] sm:$0xff] }
  0x62   :  { %1675 = vmatpush1.bf16.msra.mxu0 %v2290_v7  ;;  %v25_v7 = vld [vmem:[%s3376_s1 + $0x30] sm:$0xff] }
  0x63   :  { %1761 = vmatpush1.bf16.msra.mxu1 %v2292_v8  ;;  %1676 = vmatprep.subr.bf16.mxu0 %v2299_v9  ;;  %v22_v8 = vld [vmem:[%s3376_s1 + $0x18] sm:$0xff]  ;;  %v2111_v13 = vcombine.high %v21_v6, %v25_v7  ;;  %v2110_v21 = vcombine.low %v21_v6, %v25_v7 }
  0x64   :  { %1762 = vmatprep.subr.bf16.mxu1 %v2301_v11  ;;  %v26_v9 = vld [vmem:[%s3376_s1 + $0x38] sm:$0xff]  ;;  %v2354_v11 = vcombine.low %v267_v62, %v271_v63 }
  0x65   :  { %v2113_v14 = vcombine.high %v22_v8, %v26_v9  ;;  %v2112_v22 = vcombine.low %v22_v8, %v26_v9  ;;  %v85_v9 = vld [vmem:[%s3376_s1 + $0x210] sm:$0xff] }
  0x66   :  { %1677 = vmatpush1.bf16.msra.mxu0 %v2298_v16  ;;  %v33_v16 = vld [vmem:[%s3376_s1 + $0x70] sm:$0xff] }
  0x67   :  { %1763 = vmatpush1.bf16.msra.mxu1 %v2300_v17  ;;  %1678 = vmatprep.subr.bf16.mxu0 %v2307_v18  ;;  %v2912_v17 = vld [vmem:[%s3375_s0 + $0x8] ss:$16 sps:$4 sm:$0xff]   ;;  %v2119_v23 = vcombine.high %v29_v15, %v33_v16  ;;  %v2118_v29 = vcombine.low %v29_v15, %v33_v16 }
  0x68   :  { %1764 = vmatprep.subr.bf16.mxu1 %v2309_v20  ;;  %v30_v18 = vld [vmem:[%s3376_s1 + $0x58] sm:$0xff] }
  0x69   :  { %v34_v20 = vld [vmem:[%s3376_s1 + $0x78] sm:$0xff] }
  0x6a   :  { %1679 = vmatpush1.bf16.msra.mxu0 %v2306_v25  ;;  %v2121_v24 = vcombine.high %v30_v18, %v34_v20  ;;  %v37_v25 = vld [vmem:[%s3376_s1 + $0x90] sm:$0xff]  ;;  %v2120_v30 = vcombine.low %v30_v18, %v34_v20 }
  0x6b   :  { %1765 = vmatpush1.bf16.msra.mxu1 %v2308_v26  ;;  %1680 = vmatprep.subr.bf16.mxu0 %v2315_v27  ;;  %v41_v26 = vld [vmem:[%s3376_s1 + $0xb0] sm:$0xff]  ;;  %v38_v27 = vld [vmem:[%s3376_s1 + $0x98] sm:$0xff] }
  0x6c   :  { %1766 = vmatprep.subr.bf16.mxu1 %v2317_v28  ;;  %v42_v28 = vld [vmem:[%s3376_s1 + $0xb8] sm:$0xff]  ;;  %v2127_v31 = vcombine.high %v37_v25, %v41_v26  ;;  %v2126_v37 = vcombine.low %v37_v25, %v41_v26  ;;  %v93_v20 = vld [vmem:[%s3376_s1 + $0x250] sm:$0xff] }
  0x6d   :  { %v2129_v32 = vcombine.high %v38_v27, %v42_v28  ;;  %v2128_v38 = vcombine.low %v38_v27, %v42_v28  ;;  %v101_v28 = vld [vmem:[%s3376_s1 + $0x290] sm:$0xff] }
  0x6e   :  { %1681 = vmatpush1.bf16.msra.mxu0 %v2314_v33  ;;  %v45_v33 = vld [vmem:[%s3376_s1 + $0xd0] sm:$0xff] }
  0x6f   :  { %1767 = vmatpush1.bf16.msra.mxu1 %v2316_v34  ;;  %1682 = vmatprep.subr.bf16.mxu0 %v2323_v35  ;;  %v49_v34 = vld [vmem:[%s3376_s1 + $0xf0] sm:$0xff]  ;;  %v46_v35 = vld [vmem:[%s3376_s1 + $0xd8] sm:$0xff] }
  0x70   :  { %1768 = vmatprep.subr.bf16.mxu1 %v2325_v36  ;;  %v50_v36 = vld [vmem:[%s3376_s1 + $0xf8] sm:$0xff]  ;;  %v2135_v39 = vcombine.high %v45_v33, %v49_v34 }
  0x71   :  { %v2137_v40 = vcombine.high %v46_v35, %v50_v36  ;;  %v2136_v45 = vcombine.low %v46_v35, %v50_v36  ;;  %v109_v36 = vld [vmem:[%s3376_s1 + $0x2d0] sm:$0xff] }
  0x72   :  { %1683 = vmatpush1.bf16.msra.mxu0 %v2322_v41  ;;  %v53_v41 = vld [vmem:[%s3376_s1 + $0x110] sm:$0xff] }
  0x73   :  { %1769 = vmatpush1.bf16.msra.mxu1 %v2324_v42  ;;  %1684 = vmatprep.subr.bf16.mxu0 %v2331_v43  ;;  %v57_v42 = vld [vmem:[%s3376_s1 + $0x130] sm:$0xff]  ;;  %v58_v43 = vld [vmem:[%s3376_s1 + $0x138] sm:$0xff] }
  0x74   :  { %1770 = vmatprep.subr.bf16.mxu1 %v2333_v44  ;;  %v2134_v44 = vcombine.low %v45_v33, %v49_v34  ;;  %v2143_v46 = vcombine.high %v53_v41, %v57_v42 }
  0x76   :  { %1685 = vmatpush1.bf16.msra.mxu0 %v2330_v49  ;;  %v65_v49 = vld [vmem:[%s3376_s1 + $0x170] sm:$0xff] }
  0x77   :  { %1771 = vmatpush1.bf16.msra.mxu1 %v2332_v50  ;;  %1686 = vmatprep.subr.bf16.mxu0 %v2339_v51  ;;  %v62_v50 = vld [vmem:[%s3376_s1 + $0x158] sm:$0xff]  ;;  %v2151_v54 = vcombine.high %v61_v48, %v65_v49 }
  0x78   :  { %1772 = vmatprep.subr.bf16.mxu1 %v2341_v52  ;;  %v66_v51 = vld [vmem:[%s3376_s1 + $0x178] sm:$0xff]  ;;  %v2142_v52 = vcombine.low %v53_v41, %v57_v42 }
  0x79   :  { %v2153_v55 = vcombine.high %v62_v50, %v66_v51  ;;  %v2152_v62 = vcombine.low %v62_v50, %v66_v51  ;;  %v125_v51 = vld [vmem:[%s3376_s1 + $0x350] sm:$0xff] }
  0x7a   :  { %1687 = vmatpush1.bf16.msra.mxu0 %v2338_v58  ;;  %v73_v58 = vld [vmem:[%s3376_s1 + $0x1b0] sm:$0xff] }
  0x7b   :  { %1773 = vmatpush1.bf16.msra.mxu1 %v2340_v59  ;;  %1688 = vmatprep.subr.bf16.mxu0 %v2347_v60  ;;  %v70_v59 = vld [vmem:[%s3376_s1 + $0x198] sm:$0xff]  ;;  %v2159_v63 = vcombine.high %v69_v57, %v73_v58 }
  0x7c   :  { %1774 = vmatprep.subr.bf16.mxu1 %v2349_v61  ;;  %v74_v60 = vld [vmem:[%s3376_s1 + $0x1b8] sm:$0xff]  ;;  %v2150_v61 = vcombine.low %v61_v48, %v65_v49 }
  0x7d   :  { %v2161_v0 = vcombine.high %v70_v59, %v74_v60  ;;  %v2160_v6 = vcombine.low %v70_v59, %v74_v60  ;;  %v133_v60 = vld [vmem:[%s3376_s1 + $0x390] sm:$0xff] }
  0x7e   :  { %1689 = vmatpush1.bf16.msra.mxu0 %v2346_v2  ;;  %v81_v2 = vld [vmem:[%s3376_s1 + $0x1f0] sm:$0xff] }
  0x7f   :  { %1775 = vmatpush1.bf16.msra.mxu1 %v2348_v3  ;;  %1690 = vmatprep.subr.bf16.mxu0 %v2355_v4  ;;  %v78_v3 = vld [vmem:[%s3376_s1 + $0x1d8] sm:$0xff]  ;;  %v2167_v7 = vcombine.high %v77_v1, %v81_v2 }
  0x80   :  { %1776 = vmatprep.subr.bf16.mxu1 %v2357_v5  ;;  %v82_v4 = vld [vmem:[%s3376_s1 + $0x1f8] sm:$0xff]  ;;  %v2158_v5 = vcombine.low %v69_v57, %v73_v58 }
  0x81   :  { %v2169_v8 = vcombine.high %v78_v3, %v82_v4  ;;  %v2168_v15 = vcombine.low %v78_v3, %v82_v4  ;;  %v141_v4 = vld [vmem:[%s3376_s1 + $0x3d0] sm:$0xff] }
  0x82   :  { %1691 = vmatpush1.bf16.msra.mxu0 %v2354_v11  ;;  %v89_v11 = vld [vmem:[%s3376_s1 + $0x230] sm:$0xff] }
  0x83   :  { %1777 = vmatpush1.bf16.msra.mxu1 %v2356_v12  ;;  %1789 = vmatprep.subr.bf16.mxu0 %v2111_v13  ;;  %v86_v12 = vld [vmem:[%s3376_s1 + $0x218] sm:$0xff]  ;;  %v2175_v16 = vcombine.high %v85_v9, %v89_v11 }
  0x84   :  { %1875 = vmatprep.subr.bf16.mxu1 %v2113_v14  ;;  %v90_v13 = vld [vmem:[%s3376_s1 + $0x238] sm:$0xff]  ;;  %v2166_v14 = vcombine.low %v77_v1, %v81_v2 }
  0x85   :  { %1693 = vmatmul.mubr.bf16.vlgmr.msra.gmra.mrb[0].mxu0 %v2912_v17  ;;  %v2177_v18 = vcombine.high %v86_v12, %v90_v13  ;;  %v2176_v25 = vcombine.low %v86_v12, %v90_v13  ;;  %v149_v13 = vld [vmem:[%s3376_s1 + $0x410] sm:$0xff] }
  0x86   :  { %1779 = vmatmul.mubr.bf16.vlgmr.msra.gmra.mrb[0].mxu1 %v2912_v17  ;;  %1790 = vmatpush1.bf16.msra.mxu0 %v2110_v21  ;;  %v97_v21 = vld [vmem:[%s3376_s1 + $0x270] sm:$0xff] }
  0x87   :  { %1876 = vmatpush1.bf16.msra.mxu1 %v2112_v22  ;;  %1791 = vmatprep.subr.bf16.mxu0 %v2119_v23  ;;  %v94_v22 = vld [vmem:[%s3376_s1 + $0x258] sm:$0xff]  ;;  %v2183_v26 = vcombine.high %v93_v20, %v97_v21 }
  0x88   :  { %1877 = vmatprep.subr.bf16.mxu1 %v2121_v24  ;;  %1821 = vmatprep.mubr.bf16.mxu0 %v2579_v56  ;;  %v98_v23 = vld [vmem:[%s3376_s1 + $0x278] sm:$0xff]  ;;  %v2174_v24 = vcombine.low %v85_v9, %v89_v11 }
  0x89   :  { %1907 = vmatprep.mubr.bf16.mxu1 %v2579_v56  ;;  %v54_v56 = vld [vmem:[%s3376_s1 + $0x118] sm:$0xff]  ;;  %v2185_v27 = vcombine.high %v94_v22, %v98_v23  ;;  %v2184_v33 = vcombine.low %v94_v22, %v98_v23  ;;  %v157_v23 = vld [vmem:[%s3376_s1 + $0x450] sm:$0xff] }
  0x8a   :  { %1792 = vmatpush1.bf16.msra.mxu0 %v2118_v29  ;;  %v2145_v47 = vcombine.high %v54_v56, %v58_v43  ;;  %v2144_v53 = vcombine.low %v54_v56, %v58_v43  ;;  %v105_v29 = vld [vmem:[%s3376_s1 + $0x2b0] sm:$0xff] }
  0x8b   :  { %1878 = vmatpush1.bf16.msra.mxu1 %v2120_v30  ;;  %1793 = vmatprep.subr.bf16.mxu0 %v2127_v31  ;;  %v102_v30 = vld [vmem:[%s3376_s1 + $0x298] sm:$0xff]  ;;  %v2191_v34 = vcombine.high %v101_v28, %v105_v29  ;;  %v117_v43 = vld [vmem:[%s3376_s1 + $0x310] sm:$0xff] }
  0x8c   :  { %1879 = vmatprep.subr.bf16.mxu1 %v2129_v32  ;;  %v106_v31 = vld [vmem:[%s3376_s1 + $0x2b8] sm:$0xff]  ;;  %v2182_v32 = vcombine.low %v93_v20, %v97_v21 }
  0x8d   :  { %v2193_v35 = vcombine.high %v102_v30, %v106_v31  ;;  %v2192_v41 = vcombine.low %v102_v30, %v106_v31  ;;  %v165_v31 = vld [vmem:[%s3376_s1 + $0x490] sm:$0xff] }
  0x8e   :  { %1794 = vmatpush1.bf16.msra.mxu0 %v2126_v37  ;;  %v113_v37 = vld [vmem:[%s3376_s1 + $0x2f0] sm:$0xff] }
  0x8f   :  { %1880 = vmatpush1.bf16.msra.mxu1 %v2128_v38  ;;  %1795 = vmatprep.subr.bf16.mxu0 %v2135_v39  ;;  %v110_v38 = vld [vmem:[%s3376_s1 + $0x2d8] sm:$0xff]  ;;  %v2199_v42 = vcombine.high %v109_v36, %v113_v37 }
  0x90   :  { %1881 = vmatprep.subr.bf16.mxu1 %v2137_v40  ;;  %v114_v39 = vld [vmem:[%s3376_s1 + $0x2f8] sm:$0xff]  ;;  %v2190_v40 = vcombine.low %v101_v28, %v105_v29 }
  0x91   :  { %v2201_v56 = vcombine.high %v110_v38, %v114_v39  ;;  %v2200_v48 = vcombine.low %v110_v38, %v114_v39  ;;  %v173_v39 = vld [vmem:[%s3376_s1 + $0x4d0] sm:$0xff] }
  0x92   :  { %1796 = vmatpush1.bf16.msra.mxu0 %v2134_v44  ;;  %v121_v44 = vld [vmem:[%s3376_s1 + $0x330] sm:$0xff] }
  0x93   :  { %1882 = vmatpush1.bf16.msra.mxu1 %v2136_v45  ;;  %1797 = vmatprep.subr.bf16.mxu0 %v2143_v46  ;;  %v118_v45 = vld [vmem:[%s3376_s1 + $0x318] sm:$0xff]  ;;  %v2207_v49 = vcombine.high %v117_v43, %v121_v44 }
  0x94   :  { %1883 = vmatprep.subr.bf16.mxu1 %v2145_v47  ;;  %v122_v46 = vld [vmem:[%s3376_s1 + $0x338] sm:$0xff]  ;;  %v2198_v47 = vcombine.low %v109_v36, %v113_v37 }
  0x95   :  { %v2209_v50 = vcombine.high %v118_v45, %v122_v46  ;;  %v2208_v57 = vcombine.low %v118_v45, %v122_v46  ;;  %v181_v45 = vld [vmem:[%s3376_s1 + $0x510] sm:$0xff] }
  0x96   :  { %1798 = vmatpush1.bf16.msra.mxu0 %v2142_v52  ;;  %v129_v52 = vld [vmem:[%s3376_s1 + $0x370] sm:$0xff] }
  0x97   :  { %1884 = vmatpush1.bf16.msra.mxu1 %v2144_v53  ;;  %1799 = vmatprep.subr.bf16.mxu0 %v2151_v54  ;;  %v126_v53 = vld [vmem:[%s3376_s1 + $0x358] sm:$0xff]  ;;  %v2215_v58 = vcombine.high %v125_v51, %v129_v52  ;;  %v185_v46 = vld [vmem:[%s3376_s1 + $0x530] sm:$0xff] }
  0x98   :  { %1885 = vmatprep.subr.bf16.mxu1 %v2153_v55  ;;  %v130_v54 = vld [vmem:[%s3376_s1 + $0x378] sm:$0xff]  ;;  %v2206_v55 = vcombine.low %v117_v43, %v121_v44 }
  0x99   :  { %v2217_v59 = vcombine.high %v126_v53, %v130_v54  ;;  %v2216_v1 = vcombine.low %v126_v53, %v130_v54  ;;  %v193_v53 = vld [vmem:[%s3376_s1 + $0x570] sm:$0xff]  ;;  %v190_v54 = vld [vmem:[%s3376_s1 + $0x558] sm:$0xff] }
  0x9a   :  { %1800 = vmatpush1.bf16.msra.mxu0 %v2150_v61  ;;  %v137_v61 = vld [vmem:[%s3376_s1 + $0x3b0] sm:$0xff] }
  0x9b   :  { %1886 = vmatpush1.bf16.msra.mxu1 %v2152_v62  ;;  %1801 = vmatprep.subr.bf16.mxu0 %v2159_v63  ;;  %v134_v62 = vld [vmem:[%s3376_s1 + $0x398] sm:$0xff]  ;;  %v2223_v2 = vcombine.high %v133_v60, %v137_v61 }
  0x9c   :  { %1887 = vmatprep.subr.bf16.mxu1 %v2161_v0  ;;  %v138_v63 = vld [vmem:[%s3376_s1 + $0x3b8] sm:$0xff]  ;;  %v2214_v0 = vcombine.low %v125_v51, %v129_v52  ;;  %v189_v52 = vld [vmem:[%s3376_s1 + $0x550] sm:$0xff] }
  0x9d   :  { %v2225_v3 = vcombine.high %v134_v62, %v138_v63  ;;  %v2224_v9 = vcombine.low %v134_v62, %v138_v63  ;;  %v201_v62 = vld [vmem:[%s3376_s1 + $0x5b0] sm:$0xff]  ;;  %v198_v63 = vld [vmem:[%s3376_s1 + $0x598] sm:$0xff] }
  0x9e   :  { %1802 = vmatpush1.bf16.msra.mxu0 %v2158_v5  ;;  %v145_v5 = vld [vmem:[%s3376_s1 + $0x3f0] sm:$0xff] }
  0x9f   :  { %1888 = vmatpush1.bf16.msra.mxu1 %v2160_v6  ;;  %1803 = vmatprep.subr.bf16.mxu0 %v2167_v7  ;;  %v142_v6 = vld [vmem:[%s3376_s1 + $0x3d8] sm:$0xff]  ;;  %v2231_v11 = vcombine.high %v141_v4, %v145_v5 }
  0xa0   :  { %1889 = vmatprep.subr.bf16.mxu1 %v2169_v8  ;;  %v146_v7 = vld [vmem:[%s3376_s1 + $0x3f8] sm:$0xff]  ;;  %v2222_v8 = vcombine.low %v133_v60, %v137_v61  ;;  %v197_v61 = vld [vmem:[%s3376_s1 + $0x590] sm:$0xff] }
  0xa1   :  { %v2233_v12 = vcombine.high %v142_v6, %v146_v7  ;;  %v2232_v20 = vcombine.low %v142_v6, %v146_v7  ;;  %v209_v6 = vld [vmem:[%s3376_s1 + $0x5f0] sm:$0xff]  ;;  %v206_v7 = vld [vmem:[%s3376_s1 + $0x5d8] sm:$0xff] }
  0xa2   :  { %1804 = vmatpush1.bf16.msra.mxu0 %v2166_v14  ;;  %v153_v14 = vld [vmem:[%s3376_s1 + $0x430] sm:$0xff] }
  0xa3   :  { %1890 = vmatpush1.bf16.msra.mxu1 %v2168_v15  ;;  %1805 = vmatprep.subr.bf16.mxu0 %v2175_v16  ;;  %v150_v15 = vld [vmem:[%s3376_s1 + $0x418] sm:$0xff]  ;;  %v2239_v21 = vcombine.high %v149_v13, %v153_v14 }
  0xa4   :  { %1891 = vmatprep.subr.bf16.mxu1 %v2177_v18  ;;  %v154_v16 = vld [vmem:[%s3376_s1 + $0x438] sm:$0xff]  ;;  %v2230_v18 = vcombine.low %v141_v4, %v145_v5  ;;  %v205_v5 = vld [vmem:[%s3376_s1 + $0x5d0] sm:$0xff] }
  0xa5   :  { %v2241_v22 = vcombine.high %v150_v15, %v154_v16  ;;  %v2240_v28 = vcombine.low %v150_v15, %v154_v16  ;;  %v217_v15 = vld [vmem:[%s3376_s1 + $0x630] sm:$0xff]  ;;  %v214_v16 = vld [vmem:[%s3376_s1 + $0x618] sm:$0xff] }
  0xa6   :  { %1806 = vmatpush1.bf16.msra.mxu0 %v2174_v24  ;;  %v161_v24 = vld [vmem:[%s3376_s1 + $0x470] sm:$0xff] }
  0xa7   :  { %1892 = vmatpush1.bf16.msra.mxu1 %v2176_v25  ;;  %1807 = vmatprep.subr.bf16.mxu0 %v2183_v26  ;;  %v158_v25 = vld [vmem:[%s3376_s1 + $0x458] sm:$0xff]  ;;  %v2247_v29 = vcombine.high %v157_v23, %v161_v24 }
  0xa8   :  { %1893 = vmatprep.subr.bf16.mxu1 %v2185_v27  ;;  %v162_v26 = vld [vmem:[%s3376_s1 + $0x478] sm:$0xff]  ;;  %v2238_v27 = vcombine.low %v149_v13, %v153_v14  ;;  %v213_v14 = vld [vmem:[%s3376_s1 + $0x610] sm:$0xff] }
  0xa9   :  { %v2249_v30 = vcombine.high %v158_v25, %v162_v26  ;;  %v2248_v36 = vcombine.low %v158_v25, %v162_v26  ;;  %v225_v25 = vld [vmem:[%s3376_s1 + $0x670] sm:$0xff]  ;;  %v222_v26 = vld [vmem:[%s3376_s1 + $0x658] sm:$0xff] }
  0xaa   :  { %1808 = vmatpush1.bf16.msra.mxu0 %v2182_v32  ;;  %v169_v32 = vld [vmem:[%s3376_s1 + $0x4b0] sm:$0xff] }
  0xab   :  { %1894 = vmatpush1.bf16.msra.mxu1 %v2184_v33  ;;  %1809 = vmatprep.subr.bf16.mxu0 %v2191_v34  ;;  %v166_v33 = vld [vmem:[%s3376_s1 + $0x498] sm:$0xff]  ;;  %v2255_v37 = vcombine.high %v165_v31, %v169_v32 }
  0xac   :  { %1895 = vmatprep.subr.bf16.mxu1 %v2193_v35  ;;  %v170_v34 = vld [vmem:[%s3376_s1 + $0x4b8] sm:$0xff]  ;;  %v2246_v35 = vcombine.low %v157_v23, %v161_v24  ;;  %v221_v24 = vld [vmem:[%s3376_s1 + $0x650] sm:$0xff] }
  0xad   :  { %v2257_v38 = vcombine.high %v166_v33, %v170_v34 }
  0xae   :  { %1810 = vmatpush1.bf16.msra.mxu0 %v2190_v40  ;;  %v177_v40 = vld [vmem:[%s3376_s1 + $0x4f0] sm:$0xff] }
  0xaf   :  { %1896 = vmatpush1.bf16.msra.mxu1 %v2192_v41  ;;  %1811 = vmatprep.subr.bf16.mxu0 %v2199_v42  ;;  %v178_v41 = vld [vmem:[%s3376_s1 + $0x4f8] sm:$0xff]  ;;  %v2254_v42 = vcombine.low %v165_v31, %v169_v32  ;;  %v2263_v43 = vcombine.high %v173_v39, %v177_v40  ;;  %v229_v32 = vld [vmem:[%s3376_s1 + $0x690] sm:$0xff] }
  0xb0   :  { %1897 = vmatprep.subr.bf16.mxu1 %v2201_v56  ;;  %v2256_v56 = vcombine.low %v166_v33, %v170_v34  ;;  %v233_v33 = vld [vmem:[%s3376_s1 + $0x6b0] sm:$0xff]  ;;  %v230_v34 = vld [vmem:[%s3376_s1 + $0x698] sm:$0xff] }
  0xb2   :  { %1812 = vmatpush1.bf16.msra.mxu0 %v2198_v47  ;;  %v186_v47 = vld [vmem:[%s3376_s1 + $0x538] sm:$0xff] }
  0xb3   :  { %1898 = vmatpush1.bf16.msra.mxu1 %v2200_v48  ;;  %1813 = vmatprep.subr.bf16.mxu0 %v2207_v49  ;;  %v2262_v48 = vcombine.low %v173_v39, %v177_v40  ;;  %v237_v40 = vld [vmem:[%s3376_s1 + $0x6d0] sm:$0xff] }
  0xb4   :  { %1899 = vmatprep.subr.bf16.mxu1 %v2209_v50  ;;  %v2271_v50 = vcombine.high %v181_v45, %v185_v46 }
  0xb6   :  { %1814 = vmatpush1.bf16.msra.mxu0 %v2206_v55  ;;  %v194_v55 = vld [vmem:[%s3376_s1 + $0x578] sm:$0xff] }
  0xb7   :  { %1900 = vmatpush1.bf16.msra.mxu1 %v2208_v57  ;;  %1815 = vmatprep.subr.bf16.mxu0 %v2215_v58  ;;  %v2270_v57 = vcombine.low %v181_v45, %v185_v46  ;;  %v2281_v60 = vcombine.high %v190_v54, %v194_v55  ;;  %v245_v46 = vld [vmem:[%s3376_s1 + $0x710] sm:$0xff] }
  0xb8   :  { %1901 = vmatprep.subr.bf16.mxu1 %v2217_v59  ;;  %v2279_v59 = vcombine.high %v189_v52, %v193_v53 }
  0xba   :  { %1816 = vmatpush1.bf16.msra.mxu0 %v2214_v0  ;;  %v202_v0 = vld [vmem:[%s3376_s1 + $0x5b8] sm:$0xff] }
  0xbb   :  { %1902 = vmatpush1.bf16.msra.mxu1 %v2216_v1  ;;  %1817 = vmatprep.subr.bf16.mxu0 %v2223_v2  ;;  %v2278_v1 = vcombine.low %v189_v52, %v193_v53  ;;  %v2280_v2 = vcombine.low %v190_v54, %v194_v55  ;;  %v2289_v4 = vcombine.high %v198_v63, %v202_v0  ;;  %v253_v53 = vld [vmem:[%s3376_s1 + $0x750] sm:$0xff]  ;;  %v254_v55 = vld [vmem:[%s3376_s1 + $0x758] sm:$0xff] }
  0xbc   :  { %1903 = vmatprep.subr.bf16.mxu1 %v2225_v3  ;;  %v2287_v3 = vcombine.high %v197_v61, %v201_v62  ;;  %v257_v54 = vld [vmem:[%s3376_s1 + $0x770] sm:$0xff] }
  0xbe   :  { %1818 = vmatpush1.bf16.msra.mxu0 %v2222_v8  ;;  %v210_v8 = vld [vmem:[%s3376_s1 + $0x5f8] sm:$0xff] }
  0xbf   :  { %1904 = vmatpush1.bf16.msra.mxu1 %v2224_v9  ;;  %1819 = vmatprep.subr.bf16.mxu0 %v2231_v11  ;;  %v2286_v9 = vcombine.low %v197_v61, %v201_v62  ;;  %v2288_v11 = vcombine.low %v198_v63, %v202_v0  ;;  %v2297_v13 = vcombine.high %v206_v7, %v210_v8  ;;  %v261_v62 = vld [vmem:[%s3376_s1 + $0x790] sm:$0xff]  ;;  %v262_v0 = vld [vmem:[%s3376_s1 + $0x798] sm:$0xff] }
  0xc0   :  { %1905 = vmatprep.subr.bf16.mxu1 %v2233_v12  ;;  %v2295_v12 = vcombine.high %v205_v5, %v209_v6  ;;  %v265_v63 = vld [vmem:[%s3376_s1 + $0x7b0] sm:$0xff] }
  0xc2   :  { %1820 = vmatpush1.bf16.msra.mxu0 %v2230_v18  ;;  %v218_v18 = vld [vmem:[%s3376_s1 + $0x638] sm:$0xff] }
  0xc3   :  { %1906 = vmatpush1.bf16.msra.mxu1 %v2232_v20  ;;  %1832 = vmatprep.subr.bf16.mxu0 %v2239_v21  ;;  %v2294_v20 = vcombine.low %v205_v5, %v209_v6  ;;  %v2296_v21 = vcombine.low %v206_v7, %v210_v8  ;;  %v2305_v23 = vcombine.high %v214_v16, %v218_v18  ;;  %v269_v6 = vld [vmem:[%s3376_s1 + $0x7d0] sm:$0xff]  ;;  %v270_v8 = vld [vmem:[%s3376_s1 + $0x7d8] sm:$0xff] }
  0xc4   :  { %1918 = vmatprep.subr.bf16.mxu1 %v2241_v22  ;;  %v2303_v22 = vcombine.high %v213_v14, %v217_v15  ;;  %v273_v7 = vld [vmem:[%s3376_s1 + $0x7f0] sm:$0xff] }
  0xc5   :  { %1822 = vmatmul.mubr.bf16.vlgmr.msra.gmra.mrb[4].mxu0 %v2706_v10 }
  0xc6   :  { %1833 = vmatpush1.bf16.msra.mxu0 %v2238_v27  ;;  %1908 = vmatmul.mubr.bf16.vlgmr.msra.gmra.mrb[4].mxu1 %v2706_v10  ;;  %v174_v10 = vld [vmem:[%s3376_s1 + $0x4d8] sm:$0xff] }
  0xc7   :  { %1919 = vmatpush1.bf16.msra.mxu1 %v2240_v28  ;;  %1834 = vmatprep.subr.bf16.mxu0 %v2247_v29  ;;  %v2265_v44 = vcombine.high %v174_v10, %v178_v41  ;;  %v2264_v49 = vcombine.low %v174_v10, %v178_v41  ;;  %v226_v27 = vld [vmem:[%s3376_s1 + $0x678] sm:$0xff]  ;;  %v2302_v28 = vcombine.low %v213_v14, %v217_v15  ;;  %v241_v10 = vld [vmem:[%s3376_s1 + $0x6f0] sm:$0xff] }
  0xc8   :  { %1920 = vmatprep.subr.bf16.mxu1 %v2249_v30  ;;  %1864 = vmatprep.mubr.bf16.mxu0 %v2723_v19  ;;  %v2304_v29 = vcombine.low %v214_v16, %v218_v18  ;;  %v2311_v30 = vcombine.high %v221_v24, %v225_v25  ;;  %v2313_v31 = vcombine.high %v222_v26, %v226_v27  ;;  %v238_v41 = vld [vmem:[%s3376_s1 + $0x6d8] sm:$0xff] }
  0xc9   :  { %1950 = vmatprep.mubr.bf16.mxu1 %v2723_v19  ;;  %v182_v19 = vld [vmem:[%s3376_s1 + $0x518] sm:$0xff]  ;;  %v2358_v15 = vcombine.low %v269_v6, %v273_v7 }
  0xca   :  { %1835 = vmatpush1.bf16.msra.mxu0 %v2246_v35  ;;  %v2273_v51 = vcombine.high %v182_v19, %v186_v47  ;;  %v2272_v58 = vcombine.low %v182_v19, %v186_v47  ;;  %v234_v35 = vld [vmem:[%s3376_s1 + $0x6b8] sm:$0xff]  ;;  %v249_v19 = vld [vmem:[%s3376_s1 + $0x730] sm:$0xff] }
  0xcb   :  { %1921 = vmatpush1.bf16.msra.mxu1 %v2248_v36  ;;  %1836 = vmatprep.subr.bf16.mxu0 %v2255_v37  ;;  %v2310_v36 = vcombine.low %v221_v24, %v225_v25  ;;  %v2312_v37 = vcombine.low %v222_v26, %v226_v27  ;;  %v2321_v39 = vcombine.high %v230_v34, %v234_v35  ;;  %v246_v47 = vld [vmem:[%s3376_s1 + $0x718] sm:$0xff]  ;;  %v277_v27 = vlaneseq }
  0xcc   :  { %1922 = vmatprep.subr.bf16.mxu1 %v2257_v38  ;;  %v2319_v38 = vcombine.high %v229_v32, %v233_v33 }
  0xce   :  { %1837 = vmatpush1.bf16.msra.mxu0 %v2254_v42  ;;  %v242_v42 = vld [vmem:[%s3376_s1 + $0x6f8] sm:$0xff] }
  0xcf   :  { %1923 = vmatpush1.bf16.msra.mxu1 %v2256_v56  ;;  %1838 = vmatprep.subr.bf16.mxu0 %v2263_v43  ;;  %v2318_v56 = vcombine.low %v229_v32, %v233_v33  ;;  %v2320_v43 = vcombine.low %v230_v34, %v234_v35  ;;  %v2329_v45 = vcombine.high %v238_v41, %v242_v42 }
  0xd0   :  { %1924 = vmatprep.subr.bf16.mxu1 %v2265_v44  ;;  %v2327_v44 = vcombine.high %v237_v40, %v241_v10 }
  0xd2   :  { %1839 = vmatpush1.bf16.msra.mxu0 %v2262_v48  ;;  %v250_v48 = vld [vmem:[%s3376_s1 + $0x738] sm:$0xff] }
  0xd3   :  { %1925 = vmatpush1.bf16.msra.mxu1 %v2264_v49  ;;  %1840 = vmatprep.subr.bf16.mxu0 %v2271_v50  ;;  %v2326_v49 = vcombine.low %v237_v40, %v241_v10  ;;  %v2328_v50 = vcombine.low %v238_v41, %v242_v42  ;;  %v2337_v52 = vcombine.high %v246_v47, %v250_v48 }
  0xd4   :  { %1926 = vmatprep.subr.bf16.mxu1 %v2273_v51  ;;  %v2335_v51 = vcombine.high %v245_v46, %v249_v19 }
  0xd6   :  { %1841 = vmatpush1.bf16.msra.mxu0 %v2270_v57  ;;  %v258_v57 = vld [vmem:[%s3376_s1 + $0x778] sm:$0xff] }
  0xd7   :  { %1927 = vmatpush1.bf16.msra.mxu1 %v2272_v58  ;;  %1842 = vmatprep.subr.bf16.mxu0 %v2279_v59  ;;  %v2334_v58 = vcombine.low %v245_v46, %v249_v19  ;;  %v2336_v59 = vcombine.low %v246_v47, %v250_v48  ;;  %v2345_v61 = vcombine.high %v254_v55, %v258_v57 }
  0xd8   :  { %1928 = vmatprep.subr.bf16.mxu1 %v2281_v60  ;;  %v2343_v60 = vcombine.high %v253_v53, %v257_v54 }
  0xda   :  { %1843 = vmatpush1.bf16.msra.mxu0 %v2278_v1  ;;  %v266_v1 = vld [vmem:[%s3376_s1 + $0x7b8] sm:$0xff] }
  0xdb   :  { %1929 = vmatpush1.bf16.msra.mxu1 %v2280_v2  ;;  %1844 = vmatprep.subr.bf16.mxu0 %v2287_v3  ;;  %v2342_v2 = vcombine.low %v253_v53, %v257_v54  ;;  %v2344_v3 = vcombine.low %v254_v55, %v258_v57  ;;  %v2353_v5 = vcombine.high %v262_v0, %v266_v1 }
  0xdc   :  { %1930 = vmatprep.subr.bf16.mxu1 %v2289_v4  ;;  %v2351_v4 = vcombine.high %v261_v62, %v265_v63 }
  0xde   :  { %1845 = vmatpush1.bf16.msra.mxu0 %v2286_v9  ;;  %v274_v9 = vld [vmem:[%s3376_s1 + $0x7f8] sm:$0xff] }
  0xdf   :  { %1931 = vmatpush1.bf16.msra.mxu1 %v2288_v11  ;;  %1846 = vmatprep.subr.bf16.mxu0 %v2295_v12  ;;  %v2350_v11 = vcombine.low %v261_v62, %v265_v63  ;;  %v2352_v12 = vcombine.low %v262_v0, %v266_v1  ;;  %v2361_v14 = vcombine.high %v270_v8, %v274_v9 }
  0xe0   :  { %1932 = vmatprep.subr.bf16.mxu1 %v2297_v13  ;;  %v2359_v13 = vcombine.high %v269_v6, %v273_v7  ;;  %v2360_v16 = vcombine.low %v270_v8, %v274_v9 }
  0xe2   :  { %1847 = vmatpush1.bf16.msra.mxu0 %v2294_v20 }
  0xe3   :  { %1933 = vmatpush1.bf16.msra.mxu1 %v2296_v21  ;;  %1848 = vmatprep.subr.bf16.mxu0 %v2303_v22 }
  0xe4   :  { %1934 = vmatprep.subr.bf16.mxu1 %v2305_v23 }
  0xe6   :  { %1849 = vmatpush1.bf16.msra.mxu0 %v2302_v28  ;;  %v278_v28 = vshrl.u32 %v277_v27, 7 }
  0xe7   :  { %1935 = vmatpush1.bf16.msra.mxu1 %v2304_v29  ;;  %1850 = vmatprep.subr.bf16.mxu0 %v2311_v30 }
  0xe8   :  { %1936 = vmatprep.subr.bf16.mxu1 %v2313_v31  ;;  %v279_v29 = vsub.s32 0, %v278_v28  ;;  %v287_v30 = vsub.s32 2, %v278_v28  ;;  %v275_v31 = vld [vmem:[%s3377_s2] sm:$0xff]  ;;  %v283_v32 = vsub.s32 1, %v278_v28  ;;  %v291_v33 = vsub.s32 3, %v278_v28  ;;  %s2463_s2 = smov [#allocation2]  }
  0xe9   :  { %v295_v35 = vsub.s32 4, %v278_v28  ;;  %v307_v40 = vsub.s32 7, %v278_v28  ;;  %s2091_s11 = sshll.u32 %s2463_s2, 4  ;;  %s2092_s11 = int_to_ptr.vmem [resolvable:$true] %s2091_s11 }
  0xea   :  { %1851 = vmatpush1.bf16.msra.mxu0 %v2310_v36  ;;  %v280_v34 = vrot.slane %v275_v31, %v279_v29  ;;  %v299_v36 = vsub.s32 5, %v278_v28  ;;  %s2439_s12 = scalar_lea.vmem %s2092_s11, 2048  ;;  %p2444_p1 = scmp.lt.s32.totalorder %s2092_s11, %s2092_s11 }
  0xeb   :  { %1937 = vmatpush1.bf16.msra.mxu1 %v2312_v37  ;;  %1852 = vmatprep.subr.bf16.mxu0 %v2319_v38  ;;  %v284_v37 = vrot.slane %v275_v31, %v283_v32  ;;  %v292_v38 = vrot.slane %v275_v31, %v291_v33  ;;  %v296_v42 = vrot.slane %v275_v31, %v295_v35  ;;  %p2440_p0 = scmp.ne.s32.totalorder %s2092_s11, %s2439_s12  ;;  %p2445_p2 = scmp.lt.s32.totalorder %s2439_s12, %s2439_s12 }
  0xec   :  { %1938 = vmatprep.subr.bf16.mxu1 %v2321_v39  ;;  %v303_v39 = vsub.s32 6, %v278_v28  ;;  %v308_v47 = vrot.slane %v275_v31, %v307_v40 }
  0xed   :  { %p2446_p3 = por %p2445_p2, %p2444_p1 }
  0xee   :  { %1853 = vmatpush1.bf16.msra.mxu0 %v2318_v56  ;;  %v300_v56 = vrot.slane %v275_v31, %v299_v36  ;;  %v304_v19 = vrot.slane %v275_v31, %v303_v39 }
  0xef   :  { %1939 = vmatpush1.bf16.msra.mxu1 %v2320_v43  ;;  %1854 = vmatprep.subr.bf16.mxu0 %v2327_v44  ;;  %p2447_p4 = pnand %p2446_p3, %p2440_p0 }
  0xf0   :  { %1940 = vmatprep.subr.bf16.mxu1 %v2329_v45 }
  0xf2   :  { %1855 = vmatpush1.bf16.msra.mxu0 %v2326_v49 }
  0xf3   :  { %1941 = vmatpush1.bf16.msra.mxu1 %v2328_v50  ;;  %1856 = vmatprep.subr.bf16.mxu0 %v2335_v51 }
  0xf4   :  { %1942 = vmatprep.subr.bf16.mxu1 %v2337_v52 }
  0xf6   :  { %1857 = vmatpush1.bf16.msra.mxu0 %v2334_v58 }
  0xf7   :  { %1943 = vmatpush1.bf16.msra.mxu1 %v2336_v59  ;;  %1858 = vmatprep.subr.bf16.mxu0 %v2343_v60 }
  0xf8   :  { %1944 = vmatprep.subr.bf16.mxu1 %v2345_v61 }
  0xfa   :  { %1859 = vmatpush1.bf16.msra.mxu0 %v2342_v2 }
  0xfb   :  { %1945 = vmatpush1.bf16.msra.mxu1 %v2344_v3  ;;  %1860 = vmatprep.subr.bf16.mxu0 %v2351_v4 }
  0xfc   :  { %1946 = vmatprep.subr.bf16.mxu1 %v2353_v5 }
  0xfe   :  { %1861 = vmatpush1.bf16.msra.mxu0 %v2350_v11 }
  0xff   :  { %1947 = vmatpush1.bf16.msra.mxu1 %v2352_v12  ;;  %1862 = vmatprep.subr.bf16.mxu0 %v2359_v13 }
 0x100   :  { %1948 = vmatprep.subr.bf16.mxu1 %v2361_v14 }
 0x102   :  { %1863 = vmatpush1.bf16.msra.mxu0 %v2358_v15 }
 0x103   :  { %1949 = vmatpush1.bf16.msra.mxu1 %v2360_v16 }
 0x105   :  { %1865 = vmatmul.mubr.bf16.vlgmr.msra.gmra.mrb[4].mxu0 %v2912_v17 }
 0x106   :  { %1951 = vmatmul.mubr.bf16.vlgmr.msra.gmra.mrb[4].mxu1 %v2912_v17  ;;  %v288_v17 = vrot.slane %v275_v31, %v287_v30 }
 0x158   :  { %v1694_v18 = vpop.f32.mrb[0].mxu0 }
 0x159   :  { %v1780_v20 = vpop.f32.mrb[0].mxu1  ;;  %v1696_v21 = vpop.f32.mrb[1].mxu0  ;;  %v2362_v10 = vadd.f32 %v1694_v18, %v280_v34 }
 0x15a   :  { %v1782_v22 = vpop.f32.mrb[1].mxu1  ;;  %v1698_v23 = vpop.f32.mrb[2].mxu0  ;;  %v2366_v41 = vadd.f32 %v1780_v20, %v288_v17  ;;  %v2363_v43 = vadd.f32 %v1696_v21, %v284_v37 }
 0x15b   :  { %v1784_v24 = vpop.f32.mrb[2].mxu1  ;;  %v1700_v25 = vpop.f32.mrb[3].mxu0  ;;  %v2367_v44 = vadd.f32 %v1782_v22, %v292_v38  ;;  %v2364_v45 = vadd.f32 %v1698_v23, %v280_v34 }
 0x15c   :  { %v1786_v26 = vpop.f32.mrb[3].mxu1  ;;  %v2368_v46 = vadd.f32 %v1784_v24, %v288_v17  ;;  %v2365_v48 = vadd.f32 %v1700_v25, %v284_v37  ;;  %v1961_v51 = vmax.f32 %v2362_v10, %v2366_v41 }
 0x15d   :  { %v2369_v49 = vadd.f32 %v1786_v26, %v292_v38  ;;  %v1962_v55 = vmax.f32 %v2363_v43, %v2367_v44 }
 0x15e   :  { %v1972_v57 = vmax.f32 %v2364_v45, %v2368_v46 }
 0x15f   :  { %v1973_v3 = vmax.f32 %v2365_v48, %v2369_v49 }
 0x1d8   :  { %v1866_v50 = vpop.f32.mrb[4].mxu0 }
 0x1d9   :  { %v2370_v52 = vadd.f32 %v1866_v50, %v296_v42  ;;  %v1952_v53 = vpop.f32.mrb[4].mxu1  ;;  %v1868_v54 = vpop.f32.mrb[5].mxu0 }
 0x1da   :  { %v2371_v58 = vadd.f32 %v1868_v54, %v300_v56  ;;  %v1954_v59 = vpop.f32.mrb[5].mxu1  ;;  %v1870_v60 = vpop.f32.mrb[6].mxu0  ;;  %v2374_v62 = vadd.f32 %v1952_v53, %v304_v19 }
 0x1db   :  { %v1963_v61 = vmax.f32 %v1961_v51, %v2370_v52  ;;  %v2375_v63 = vadd.f32 %v1954_v59, %v308_v47  ;;  %v2372_v0 = vadd.f32 %v1870_v60, %v296_v42  ;;  %v1956_v1 = vpop.f32.mrb[6].mxu1  ;;  %v1872_v2 = vpop.f32.mrb[7].mxu0 }
 0x1dc   :  { %v1964_v4 = vmax.f32 %v1962_v55, %v2371_v58  ;;  %v2373_v5 = vadd.f32 %v1872_v2, %v300_v56  ;;  %v1958_v6 = vpop.f32.mrb[7].mxu1  ;;  %v2376_v12 = vadd.f32 %v1956_v1, %v304_v19 }
 0x1dd   :  { %v1967_v7 = vsel %vm1966_vm0, %v2375_v63, -inf  ;;  %v1974_v8 = vmax.f32 %v1972_v57, %v2372_v0  ;;  %v2377_v9 = vadd.f32 %v1958_v6, %v308_v47  ;;  %v1965_v11 = vmax.f32 %v1963_v61, %v2374_v62 }
 0x1de   :  { %v1975_v13 = vmax.f32 %v1973_v3, %v2373_v5  ;;  %v1968_v14 = vmax.f32 %v1964_v4, %v1967_v7 }
 0x1df   :  { %v1977_v15 = vsel %vm1966_vm0, %v2377_v9, -inf  ;;  %v1976_v16 = vmax.f32 %v1974_v8, %v2376_v12 }
 0x1e0   :  { %v1969_v18 = vmax.f32 %v1965_v11, %v1968_v14  ;;  %v1978_v20 = vmax.f32 %v1975_v13, %v1977_v15 }
 0x1e2   :  { %1970 = vmax.xlane.f32.xlu0 %v1969_v18  ;;  %v1979_v21 = vmax.f32 %v1976_v16, %v1978_v20 }
 0x1e6   :  { %1980 = vmax.xlane.f32.xlu0 %v1979_v21 }
 0x26f   :  { %v1971_v22 = vpop.xlane.xlu0 %1970 }
 0x270   :  { %v3295_v23 = vsub.f32 %v2362_v10, %v1971_v22  ;;  %v3297_v24 = vsub.f32 %v2363_v43, %v1971_v22  ;;  %v3299_v25 = vsub.f32 %v2366_v41, %v1971_v22  ;;  %v3310_v33 = vsub.f32 %v2367_v44, %v1971_v22 }
 0x271   :  { %v3318_v37 = vsub.f32 %v2370_v52, %v1971_v22  ;;  %v3322_v40 = vsub.f32 %v2371_v58, %v1971_v22  ;;  %v3325_v41 = vsub.f32 %v2374_v62, %v1971_v22  ;;  %v3327_v42 = vsub.f32 %v2375_v63, %v1971_v22 }
 0x272   :  { %v1998_v26 = vmul.f32 1.442695, %v3295_v23  ;;  %v2000_v27 = vmul.f32 1.442695, %v3297_v24  ;;  %v2002_v29 = vmul.f32 1.442695, %v3299_v25 }
 0x273   :  { %v1981_v28 = vpop.xlane.xlu0 %1980  ;;  %v2004_v56 = vmul.f32 1.442695, %v3310_v33  ;;  %v2006_v44 = vmul.f32 1.442695, %v3318_v37  ;;  %v2010_v47 = vmul.f32 1.442695, %v3325_v41 }
 0x274   :  { %2403 = vpow2.f32 %v1998_v26  ;;  %v3304_v30 = vsub.f32 %v2364_v45, %v1981_v28  ;;  %v3306_v31 = vsub.f32 %v2365_v48, %v1981_v28  ;;  %v3308_v32 = vsub.f32 %v2368_v46, %v1981_v28 }
 0x275   :  { %2405 = vpow2.f32 %v2000_v27  ;;  %v3312_v34 = vsub.f32 %v2369_v49, %v1981_v28  ;;  %v3314_v17 = vsub.f32 %v2372_v0, %v1981_v28  ;;  %v3330_v43 = vsub.f32 %v2373_v5, %v1981_v28 }
 0x276   :  { %v2014_v35 = vmul.f32 1.442695, %v3304_v30  ;;  %v2016_v36 = vmul.f32 1.442695, %v3306_v31  ;;  %v2018_v38 = vmul.f32 1.442695, %v3308_v32  ;;  %2407 = vpow2.f32 %v2002_v29 }
 0x277   :  { %v2020_v39 = vmul.f32 1.442695, %v3312_v34  ;;  %v2022_v10 = vmul.f32 1.442695, %v3314_v17  ;;  %v3333_v45 = vsub.f32 %v2376_v12, %v1981_v28  ;;  %v2008_v46 = vmul.f32 1.442695, %v3322_v40 }
 0x278   :  { %2409 = vpow2.f32 %v2014_v35  ;;  %v3336_v19 = vsub.f32 %v2377_v9, %v1981_v28  ;;  %v2012_v48 = vmul.f32 1.442695, %v3327_v42  ;;  %v2024_v50 = vmul.f32 1.442695, %v3330_v43 }
 0x279   :  { %2411 = vpow2.f32 %v2016_v36  ;;  %v2026_v52 = vmul.f32 1.442695, %v3333_v45 }
 0x27a   :  { %2413 = vpow2.f32 %v2018_v38  ;;  %v2028_v54 = vmul.f32 1.442695, %v3336_v19 }
 0x27b   :  { %2415 = vpow2.f32 %v2020_v39 }
 0x27c   :  { %2417 = vpow2.f32 %v2022_v10 }
 0x27d   :  { %2419 = vpow2.f32 %v2004_v56 }
 0x27e   :  { %v2404_v49 = vpop.eup %2403  ;;  %2421 = vpow2.f32 %v2006_v44 }
 0x27f   :  { %v2406_v51 = vpop.eup %2405  ;;  %2423 = vpow2.f32 %v2008_v46 }
 0x280   :  { %2425 = vpow2.f32 %v2010_v47  ;;  %v2030_v53 = vadd.f32 %v2406_v51, %v2404_v49  ;;  %v2408_v55 = vpop.eup %2407 }
 0x281   :  { %2427 = vpow2.f32 %v2012_v48 }
 0x282   :  { %v2410_v57 = vpop.eup %2409  ;;  %2429 = vpow2.f32 %v2024_v50  ;;  %v2031_v60 = vadd.f32 %v2408_v55, %v2030_v53 }
 0x283   :  { %v2412_v58 = vpop.eup %2411  ;;  %2431 = vpow2.f32 %v2026_v52 }
 0x284   :  { %v2414_v59 = vpop.eup %2413  ;;  %2433 = vpow2.f32 %v2028_v54  ;;  %v2040_v61 = vadd.f32 %v2412_v58, %v2410_v57 }
 0x285   :  { %v2416_v62 = vpop.eup %2415 }
 0x286   :  { %v2418_v63 = vpop.eup %2417  ;;  %v2041_v0 = vadd.f32 %v2414_v59, %v2040_v61 }
 0x287   :  { %v2420_v1 = vpop.eup %2419 }
 0x288   :  { %v2422_v2 = vpop.eup %2421  ;;  %v2032_v3 = vadd.f32 %v2420_v1, %v2031_v60  ;;  %v2042_v4 = vadd.f32 %v2416_v62, %v2041_v0 }
 0x289   :  { %v2424_v5 = vpop.eup %2423 }
 0x28a   :  { %v2426_v6 = vpop.eup %2425  ;;  %v2033_v7 = vadd.f32 %v2422_v2, %v2032_v3  ;;  %v2043_v8 = vadd.f32 %v2418_v63, %v2042_v4 }
 0x28b   :  { %v2428_v9 = vpop.eup %2427 }
 0x28c   :  { %v2430_v11 = vpop.eup %2429  ;;  %v2034_v12 = vadd.f32 %v2424_v5, %v2033_v7  ;;  %v2036_v18 = vsel %vm1966_vm0, %v2428_v9, 0.0 }
 0x28d   :  { %v2432_v13 = vpop.eup %2431  ;;  %v2044_v14 = vadd.f32 %v2430_v11, %v2043_v8 }
 0x28e   :  { %v2434_v15 = vpop.eup %2433  ;;  %v2035_v16 = vadd.f32 %v2426_v6, %v2034_v12 }
 0x28f   :  { %v2045_v20 = vadd.f32 %v2432_v13, %v2044_v14  ;;  %v2046_v22 = vsel %vm1966_vm0, %v2434_v15, 0.0 }
 0x290   :  { %v2037_v21 = vadd.f32 %v2036_v18, %v2035_v16 }
 0x291   :  { %v2047_v26 = vadd.f32 %v2046_v22, %v2045_v20 }
 0x292   :  { %2038 = vadd.xlane.f32.xlu1 %v2037_v21 }
 0x296   :  { %2048 = vadd.xlane.f32.xlu1 %v2047_v26 }
 0x31f   :  { %v2039_v27 = vpop.xlane.xlu1 %2038 }
 0x320   :  { %2435 = vlog2.f32 %v2039_v27 }
 0x323   :  { %v2049_v28 = vpop.xlane.xlu1 %2048 }
 0x324   :  { %2437 = vlog2.f32 %v2049_v28 }
 0x32a   :  { %v2436_v29 = vpop.eup %2435 }
 0x32b   :  { %v2051_v35 = vmul.f32 0.6931472, %v2436_v29 }
 0x32d   :  { %v2054_v36 = vsub.f32 %v3295_v23, %v2051_v35  ;;  %v2055_v38 = vsub.f32 %v3297_v24, %v2051_v35  ;;  %v2056_v39 = vsub.f32 %v3299_v25, %v2051_v35  ;;  %v2057_v10 = vsub.f32 %v3310_v33, %v2051_v35 }
 0x32e   :  { %v2438_v56 = vpop.eup %2437  ;;  %v2058_v44 = vsub.f32 %v3318_v37, %v2051_v35  ;;  %v2059_v46 = vsub.f32 %v3322_v40, %v2051_v35  ;;  %v2060_v47 = vsub.f32 %v3325_v41, %v2051_v35  ;;  %v2061_v48 = vsub.f32 %v3327_v42, %v2051_v35 }
 0x32f   :  { %2070 = vst [vmem:[#allocation2] sm:$0xff] %v2054_v36  ;;  %2071 = vst [vmem:[#allocation2 + $0x8] sm:$0xff] %v2055_v38  ;;  %v2053_v23 = vmul.f32 0.6931472, %v2438_v56 }
 0x330   :  { %2072 = vst [vmem:[#allocation2 + $0x10] sm:$0xff] %v2056_v39  ;;  %2073 = vst [vmem:[#allocation2 + $0x18] sm:$0xff] %v2057_v10 }
 0x331   :  { %2074 = vst [vmem:[#allocation2 + $0x20] sm:$0xff] %v2058_v44  ;;  %2075 = vst [vmem:[#allocation2 + $0x28] sm:$0xff] %v2059_v46  ;;  %v2062_v24 = vsub.f32 %v3304_v30, %v2053_v23  ;;  %v2063_v25 = vsub.f32 %v3306_v31, %v2053_v23  ;;  %v2064_v33 = vsub.f32 %v3308_v32, %v2053_v23 }
 0x332   :  { %2076 = vst [vmem:[#allocation2 + $0x30] sm:$0xff] %v2060_v47  ;;  %2077 = vst.msk [vmem:[#allocation2 + $0x38] sm:$0xff] %vm1966_vm0, %v2061_v48  ;;  %v2065_v37 = vsub.f32 %v3312_v34, %v2053_v23  ;;  %v2066_v40 = vsub.f32 %v3314_v17, %v2053_v23  ;;  %v2067_v41 = vsub.f32 %v3330_v43, %v2053_v23 }
 0x333   :  { %v2068_v42 = vsub.f32 %v3333_v45, %v2053_v23  ;;  %v2069_v49 = vsub.f32 %v3336_v19, %v2053_v23  ;;  %2078 = vst [vmem:[#allocation2 + $0x40] sm:$0xff] %v2062_v24  ;;  %2079 = vst [vmem:[#allocation2 + $0x48] sm:$0xff] %v2063_v25 }
 0x334   :  { %2080 = vst [vmem:[#allocation2 + $0x50] sm:$0xff] %v2064_v33  ;;  %2081 = vst [vmem:[#allocation2 + $0x58] sm:$0xff] %v2065_v37 }
 0x335   :  { %2082 = vst [vmem:[#allocation2 + $0x60] sm:$0xff] %v2066_v40  ;;  %2083 = vst [vmem:[#allocation2 + $0x68] sm:$0xff] %v2067_v41 }
 0x336   :  { %2084 = vst [vmem:[#allocation2 + $0x70] sm:$0xff] %v2068_v42  ;;  %2085 = vst.msk [vmem:[#allocation2 + $0x78] sm:$0xff] %vm1966_vm0, %v2069_v49 }
 0x337   :  { %2450 = shalt.err (!%p2447_p4)
}
 0x338   :  { %s2451_s15 = scalar_lea.hbm %s3378_s3, 2048 }
 0x339   :  { %p2452_p5 = scmp.ne.s32.totalorder %s3378_s3, %s2451_s15  ;;  %p2455_p6 = scmp.lt.u32.totalorder %s2451_s15, %s3378_s3 }
 0x33b   :  { %p2457_p7 = pnand %p2455_p6, %p2452_p5 }
 0x33d   :  { %2460 = shalt.err (!%p2457_p7)
}
 0x33e   :  { %s2464_s20 = smov 1024   ;;  %s2465_s21 = smov 64  }
 0x33f   :  { %2097 = dma.vmem_to_hbm [thread:$0]  %s2092_s11, 2048, %s3378_s3, [#allocation3], %s2464_s20, %s2464_s20, %s2465_s21  }
 0x340   :  { %2461 = dma.done.wait [#allocation3], 2048  }
 0x341   :  { %2462 = vsyncadd [#allocation3], 4294965248 }
 0x342   :  { %2101 = vsyncpa [#allocation3], 1 }

</bundles_post_ra>
